<compile_context>
chip_gen: v7x
topology: tpu7x:2x2x1
jax: 0.10.0
libtpu: 0.0.40
codegen_flags: <defaults>
</compile_context>

<pallas_src>
import functools
import math

import jax
import jax.numpy as jnp
from jax.experimental import pallas as pl
from jax.experimental.pallas import tpu as pltpu

EMBED = 768            # constant['image embedding size'] == constant['text embedding size']
ENC_DEC_HEADS = 4
ENC_DEC_FF = 2048
BERT_LAYERS = 12
BERT_HEADS = 12
BERT_FF = 3072


def _round_up(x, m):
    return (x + m - 1) // m * m


def _vmem_limit():
    # v5e/v6e: 128 MiB physical -> allow 64 MiB scoped; v7x: 64 MiB physical -> keep 32 MiB.
    try:
        cap = getattr(pltpu.get_tpu_info(), 'vmem_capacity_bytes', None)
        if cap:
            return int(min(64 * 1024 * 1024, int(cap) // 2))
    except Exception:
        pass
    return 32 * 1024 * 1024


VMEM_LIMIT = _vmem_limit()


# ----------------------------------------------------------------------------
# Tiled matmul kernel with fused bias / activation / residual / LayerNorm epilogue
# ----------------------------------------------------------------------------
def _pick_tk(Kp):
    if Kp <= 1024:
        return Kp
    for t in range(1024, 127, -128):
        if Kp % t == 0:
            return t
    return 128


def _pick_tiles(M, K, N, want_ln=False):
    Kp = _round_up(K, 128)
    tk = _pick_tk(Kp)
    Np = _round_up(N, 128)
    if want_ln:
        tn = Np                        # full row must sit in one output tile
    elif M <= 64 and Np >= 1536 and Np % 256 == 0:
        tn = Np // 2                   # two N tiles -> both v7x TensorCores stream weights
    elif Np <= 1024:
        tn = Np
    else:
        tn = next(t for t in (1024, 896, 768, 640, 512, 384, 256, 128) if Np % t == 0)
    if M <= 256:
        tm = _round_up(M, 16)
        Mp = tm
    else:
        cap = 512 if tn <= 1024 else 256
        tm = 128
        for t in (512, 256):
            if t <= cap and (M % t == 0 or M >= 8 * t):
                tm = t
                break
        Mp = _round_up(M, tm)
    return tm, tk, tn, Mp, Kp, Np


@functools.lru_cache(maxsize=None)
def _matmul_call(Mp, Kp, Np, tm, tk, tn, act, has_res, has_ln, ln_eps, out_dtype_name):
    out_dtype = jnp.dtype(out_dtype_name)

    def kernel(*refs):
        a_ref, b_ref, bias_ref = refs[0], refs[1], refs[2]
        pos = 3
        r_ref = None
        if has_res:
            r_ref = refs[pos]
            pos += 1
        if has_ln:
            g_ref, bln_ref = refs[pos], refs[pos + 1]
            pos += 2
        o_ref, acc_ref = refs[pos], refs[pos + 1]

        @pl.when(pl.program_id(2) == 0)
        def _():
            acc_ref[...] = jnp.zeros_like(acc_ref)

        acc_ref[...] += jnp.dot(a_ref[...], b_ref[...],
                                preferred_element_type=jnp.float32)

        @pl.when(pl.program_id(2) == pl.num_programs(2) - 1)
        def _():
            y = acc_ref[...] + bias_ref[...]
            if has_res:
                y = y + r_ref[...].astype(jnp.float32)
            if act == 'relu':
                y = jnp.maximum(y, 0.0)
            elif act == 'gelu':
                # TODO(synk): BERT reference uses exact erf-GELU; tanh approximation used here.
                y = jax.nn.gelu(y, approximate=True)
            if has_ln:
                mu = jnp.mean(y, axis=-1, keepdims=True)
                var = jnp.mean(jnp.square(y - mu), axis=-1, keepdims=True)
                y = (y - mu) * jax.lax.rsqrt(var + ln_eps) * g_ref[...] + bln_ref[...]
            o_ref[...] = y.astype(out_dtype)

    in_specs = [pl.BlockSpec((tm, tk), lambda i, j, k: (i, k)),
                pl.BlockSpec((tk, tn), lambda i, j, k: (k, j)),
                pl.BlockSpec((1, tn), lambda i, j, k: (0, j))]
    if has_res:
        in_specs.append(pl.BlockSpec((tm, tn), lambda i, j, k: (i, j)))
    if has_ln:
        in_specs.append(pl.BlockSpec((1, tn), lambda i, j, k: (0, j)))
        in_specs.append(pl.BlockSpec((1, tn), lambda i, j, k: (0, j)))

    return jax.jit(pl.pallas_call(
        kernel,
        out_shape=jax.ShapeDtypeStruct((Mp, Np), out_dtype),
        grid_spec=pltpu.PrefetchScalarGridSpec(
            num_scalar_prefetch=0,
            grid=(Mp // tm, Np // tn, Kp // tk),
            in_specs=in_specs,
            out_specs=pl.BlockSpec((tm, tn), lambda i, j, k: (i, j)),
            scratch_shapes=[pltpu.VMEM((tm, tn), jnp.float32)]),
        compiler_params=pltpu.CompilerParams(
            dimension_semantics=("parallel", "parallel", "arbitrary"),
            vmem_limit_bytes=VMEM_LIMIT)))


def pallas_matmul(a, b, bias=None, act=None, residual=None, ln=None,
                  out_dtype=jnp.bfloat16):
    """out = epilogue(a @ b + bias [+ residual] [-> LayerNorm]); a:(M,K), b:(K,N)."""
    M, K = a.shape
    N = b.shape[1]
    has_ln = ln is not None and N % 128 == 0 and N <= 2048
    tm, tk, tn, Mp, Kp, Np = _pick_tiles(M, K, N, want_ln=has_ln)

    a = a.astype(jnp.bfloat16)
    b = b.astype(jnp.bfloat16)
    if (Mp, Kp) != (M, K):
        a = jnp.zeros((Mp, Kp), jnp.bfloat16).at[:M, :K].set(a)
    if (Kp, Np) != (K, N):
        b = jnp.zeros((Kp, Np), jnp.bfloat16).at[:K, :N].set(b)

    if bias is None:
        bias_p = jnp.zeros((1, Np), jnp.float32)
    else:
        bias_p = bias.astype(jnp.float32).reshape(1, N)
        if Np != N:
            bias_p = jnp.zeros((1, Np), jnp.float32).at[:, :N].set(bias_p)

    has_res = residual is not None
    args = [a, b, bias_p]
    if has_res:
        r = residual.astype(jnp.bfloat16)
        if (Mp, Np) != (M, N):
            r = jnp.zeros((Mp, Np), jnp.bfloat16).at[:M, :N].set(r)
        args.append(r)
    eps = 0.0
    if has_ln:
        g, b_ln, eps = ln
        args.append(g.astype(jnp.float32).reshape(1, N))
        args.append(b_ln.astype(jnp.float32).reshape(1, N))

    out = _matmul_call(Mp, Kp, Np, tm, tk, tn, act, has_res, has_ln, float(eps),
                       jnp.dtype(out_dtype).name)(*args)
    if (Mp, Np) != (M, N):
        out = out[:M, :N]
    if ln is not None and not has_ln:
        out = pallas_layernorm(out, ln[0], ln[1], ln[2], out_dtype=out_dtype)
    return out


# ----------------------------------------------------------------------------
# LayerNorm kernel (only for sites with no preceding matmul: BERT embedding LN)
# ----------------------------------------------------------------------------
@functools.lru_cache(maxsize=None)
def _layernorm_call(Rp, TR, D, eps, out_dtype_name):
    out_dtype = jnp.dtype(out_dtype_name)

    def kernel(x_ref, g_ref, b_ref, o_ref):
        x = x_ref[...].astype(jnp.float32)
        mu = jnp.mean(x, axis=-1, keepdims=True)
        var = jnp.mean(jnp.square(x - mu), axis=-1, keepdims=True)
        y = (x - mu) * jax.lax.rsqrt(var + eps) * g_ref[...] + b_ref[...]
        o_ref[...] = y.astype(out_dtype)

    return jax.jit(pl.pallas_call(
        kernel,
        out_shape=jax.ShapeDtypeStruct((Rp, D), out_dtype),
        grid_spec=pltpu.PrefetchScalarGridSpec(
            num_scalar_prefetch=0, grid=(Rp // TR,),
            in_specs=[pl.BlockSpec((TR, D), lambda i: (i, 0)),
                      pl.BlockSpec((1, D), lambda i: (0, 0)),
                      pl.BlockSpec((1, D), lambda i: (0, 0))],
            out_specs=pl.BlockSpec((TR, D), lambda i: (i, 0))),
        compiler_params=pltpu.CompilerParams(
            dimension_semantics=("parallel",),
            vmem_limit_bytes=VMEM_LIMIT)))


def pallas_layernorm(x2d, gamma, beta, eps, out_dtype=jnp.bfloat16):
    R, D = x2d.shape
    if R <= 512:
        TR = _round_up(R, 16)
        Rp = TR
    else:
        TR = 256
        Rp = _round_up(R, 256)
    if Rp != R:
        x2d = jnp.zeros((Rp, D), x2d.dtype).at[:R].set(x2d)
    out = _layernorm_call(Rp, TR, D, float(eps), jnp.dtype(out_dtype).name)(
        x2d, gamma.reshape(1, D).astype(jnp.float32),
        beta.reshape(1, D).astype(jnp.float32))
    return out[:R] if Rp != R else out


# ----------------------------------------------------------------------------
# Attention kernel (head-batched for short sequences, optional additive bias)
# ----------------------------------------------------------------------------
@functools.lru_cache(maxsize=None)
def _attention_call(BH, HB, Lq, Lk, dh, scale, has_bias):
    def kernel(*refs):
        if has_bias:
            q_ref, k_ref, v_ref, b_ref, o_ref = refs
        else:
            q_ref, k_ref, v_ref, o_ref = refs
            b_ref = None
        if HB == 1:
            q, k, v = q_ref[0], k_ref[0], v_ref[0]
            s = jnp.dot(q, k.T, preferred_element_type=jnp.float32) * scale
            if has_bias:
                s = s + b_ref[0]
            s = s - jnp.max(s, axis=-1, keepdims=True)
            p = jnp.exp(s)
            inv = pl.reciprocal(jnp.sum(p, axis=-1, keepdims=True), approx=True)
            p = (p * inv).astype(v.dtype)
            o_ref[0] = jnp.dot(p, v, preferred_element_type=jnp.float32).astype(jnp.bfloat16)
        else:
            q, k, v = q_ref[...], k_ref[...], v_ref[...]
            s = jnp.einsum('bqd,bkd->bqk', q, k,
                           preferred_element_type=jnp.float32) * scale
            if has_bias:
                s = s + b_ref[...]
            s = s - jnp.max(s, axis=-1, keepdims=True)
            p = jnp.exp(s)
            inv = pl.reciprocal(jnp.sum(p, axis=-1, keepdims=True), approx=True)
            p = (p * inv).astype(v.dtype)
            o_ref[...] = jnp.einsum('bqk,bkd->bqd', p, v,
                                    preferred_element_type=jnp.float32).astype(jnp.bfloat16)

    in_specs = [pl.BlockSpec((HB, Lq, dh), lambda b: (b, 0, 0)),
                pl.BlockSpec((HB, Lk, dh), lambda b: (b, 0, 0)),
                pl.BlockSpec((HB, Lk, dh), lambda b: (b, 0, 0))]
    if has_bias:
        in_specs.append(pl.BlockSpec((HB, Lq, Lk), lambda b: (b, 0, 0)))

    return jax.jit(pl.pallas_call(
        kernel,
        out_shape=jax.ShapeDtypeStruct((BH, Lq, dh), jnp.bfloat16),
        grid_spec=pltpu.PrefetchScalarGridSpec(
            num_scalar_prefetch=0, grid=(BH // HB,),
            in_specs=in_specs,
            out_specs=pl.BlockSpec((HB, Lq, dh), lambda b: (b, 0, 0))),
        compiler_params=pltpu.CompilerParams(
            dimension_semantics=("parallel",),
            vmem_limit_bytes=VMEM_LIMIT)))


def pallas_attention(q, k, v, bias, scale):
    BH, Lq, dh = q.shape
    Lk = k.shape[1]
    q = q.astype(jnp.bfloat16)
    k = k.astype(jnp.bfloat16)
    v = v.astype(jnp.bfloat16)
    has_bias = bias is not None
    args = (q, k, v, bias.astype(jnp.float32)) if has_bias else (q, k, v)
    HB = BH if Lq <= 16 else 1      # batch all heads in one grid step for tiny sequences
    try:
        return _attention_call(BH, HB, Lq, Lk, dh, float(scale), has_bias)(*args)
    except Exception:
        if HB == 1:
            raise
        return _attention_call(BH, 1, Lq, Lk, dh, float(scale), has_bias)(*args)


# ----------------------------------------------------------------------------
# Elementwise kernel (only used where matmul-epilogue fusion is impossible: maxpool)
# ----------------------------------------------------------------------------
_EW_FNS = {'max': lambda *t: functools.reduce(jnp.maximum, t)}
_EW_ROWS, _EW_LANES = 256, 512


@functools.lru_cache(maxsize=None)
def _elementwise_call(name, nargs, rows_p, dtype_name):
    fn = _EW_FNS[name]
    dtype = jnp.dtype(dtype_name)

    def kernel(*refs):
        refs[-1][...] = fn(*[r[...] for r in refs[:-1]]).astype(dtype)

    return jax.jit(pl.pallas_call(
        kernel,
        out_shape=jax.ShapeDtypeStruct((rows_p, _EW_LANES), dtype),
        grid_spec=pltpu.PrefetchScalarGridSpec(
            num_scalar_prefetch=0, grid=(rows_p // _EW_ROWS,),
            in_specs=[pl.BlockSpec((_EW_ROWS, _EW_LANES), lambda i: (i, 0))
                      for _ in range(nargs)],
            out_specs=pl.BlockSpec((_EW_ROWS, _EW_LANES), lambda i: (i, 0))),
        compiler_params=pltpu.CompilerParams(
            dimension_semantics=("parallel",),
            vmem_limit_bytes=VMEM_LIMIT)))


def pallas_elementwise(name, *xs):
    shape = xs[0].shape
    dtype = xs[0].dtype
    n = int(xs[0].size)
    block = _EW_ROWS * _EW_LANES
    n_p = _round_up(n, block)
    rows_p = n_p // _EW_LANES
    flat = []
    for x in xs:
        xr = x.reshape(-1)
        if n_p != n:
            xr = jnp.zeros((n_p,), dtype).at[:n].set(xr)
        flat.append(xr.reshape(rows_p, _EW_LANES))
    out = _elementwise_call(name, len(xs), rows_p, jnp.dtype(dtype).name)(*flat)
    return out.reshape(-1)[:n].reshape(shape)


# ----------------------------------------------------------------------------
# Implicit-GEMM 3x3 / stride-1 / pad-1 conv (no HBM im2col)
# ----------------------------------------------------------------------------
@functools.lru_cache(maxsize=None)
def _conv3x3_call(B, Hp, Wp, Ho, C, Cout, act, has_res):
    MW = Ho * Wp        # "wide" output rows: Wp columns per row, last 2 discarded by wrapper

    def kernel(*refs):
        if has_res:
            x_ref, w_ref, b_ref, r_ref, o_ref, acc_ref = refs
        else:
            x_ref, w_ref, b_ref, o_ref, acc_ref = refs
            r_ref = None
        for t in range(9):
            i, j = divmod(t, 3)
            a = x_ref[0, pl.ds(i * Wp + j, MW), :]
            contrib = jnp.dot(a, w_ref[t], preferred_element_type=jnp.float32)
            if t == 0:
                acc_ref[...] = contrib
            else:
                acc_ref[...] += contrib
        y = acc_ref[...] + b_ref[...]
        if has_res:
            y = y + r_ref[0].astype(jnp.float32)
        if act == 'relu':
            y = jnp.maximum(y, 0.0)
        o_ref[0] = y.astype(jnp.bfloat16)

    in_specs = [pl.BlockSpec((1, Hp * Wp, C), lambda b: (b, 0, 0)),
                pl.BlockSpec((9, C, Cout), lambda b: (0, 0, 0)),
                pl.BlockSpec((1, Cout), lambda b: (0, 0))]
    if has_res:
        in_specs.append(pl.BlockSpec((1, MW, Cout), lambda b: (b, 0, 0)))

    return jax.jit(pl.pallas_call(
        kernel,
        out_shape=jax.ShapeDtypeStruct((B, MW, Cout), jnp.bfloat16),
        grid_spec=pltpu.PrefetchScalarGridSpec(
            num_scalar_prefetch=0, grid=(B,),
            in_specs=in_specs,
            out_specs=pl.BlockSpec((1, MW, Cout), lambda b: (b, 0, 0)),
            scratch_shapes=[pltpu.VMEM((MW, Cout), jnp.float32)]),
        compiler_params=pltpu.CompilerParams(
            dimension_semantics=("parallel",),
            vmem_limit_bytes=VMEM_LIMIT)))


def pallas_conv3x3_s1(x, w9, bias, act=None, residual=None):
    """x: (B,H,W,C) bf16; w9: (9, C, Cout) (BN pre-folded). Returns (B,H,W,Cout)."""
    B, H, W, C = x.shape
    Ho, Wo = H, W
    Hp, Wp = H + 3, W + 2    # 1 top + 2 bottom pad rows (wide-output overrun guard), 1 left/right
    Cout = w9.shape[2]
    xflat = jnp.pad(x.astype(jnp.bfloat16),
                    ((0, 0), (1, 2), (1, 1), (0, 0))).reshape(B, Hp * Wp, C)
    args = [xflat, w9.astype(jnp.bfloat16), bias.astype(jnp.float32).reshape(1, Cout)]
    has_res = residual is not None
    if has_res:
        rw = jnp.pad(residual.astype(jnp.bfloat16),
                     ((0, 0), (0, 0), (0, Wp - Wo), (0, 0))).reshape(B, Ho * Wp, Cout)
        args.append(rw)
    out = _conv3x3_call(B, Hp, Wp, Ho, C, Cout, act, has_res)(*args)
    # drop the 2 garbage columns produced by the wide (Wp-column) output rows
    return out.reshape(B, Ho, Wp, Cout)[:, :, :Wo, :]


# ----------------------------------------------------------------------------
# im2col conv path (stem 7x7/s2, stride-2 3x3 convs, 1x1 downsamples) + maxpool
# ----------------------------------------------------------------------------
def pallas_conv2d(x, w2d, bias, kh, kw, stride, pad, act=None, residual=None):
    """x: (B, H, W, Cin) bf16; w2d: (kh*kw*Cin, Cout) bf16 (BN pre-folded)."""
    # TODO(synk): im2col only used for the 7 strided convs; stride-1 3x3 convs use the
    # implicit-GEMM kernel above.
    B, H, W, C = x.shape
    if kh == 1 and kw == 1 and pad == 0:
        xs = x if stride == 1 else x[:, ::stride, ::stride, :]
        Ho, Wo = xs.shape[1], xs.shape[2]
        patches = xs.reshape(B * Ho * Wo, C)
    else:
        xp = jnp.pad(x, ((0, 0), (pad, pad), (pad, pad), (0, 0)))
        Ho = (H + 2 * pad - kh) // stride + 1
        Wo = (W + 2 * pad - kw) // stride + 1
        slices = [xp[:, i:i + stride * Ho:stride, j:j + stride * Wo:stride, :]
                  for i in range(kh) for j in range(kw)]
        patches = jnp.stack(slices, axis=3).reshape(B * Ho * Wo, kh * kw * C)
    Cout = w2d.shape[1]
    res2d = None if residual is None else residual.reshape(B * Ho * Wo, Cout)
    out = pallas_matmul(patches, w2d, bias, act=act, residual=res2d)
    return out.reshape(B, Ho, Wo, Cout)


def conv_apply(x, cp, stride, pad, act=None, residual=None):
    k = cp['k']
    if k == 3 and stride == 1 and pad == 1:
        try:
            w9 = cp['w'].reshape(9, x.shape[-1], cp['w'].shape[1])
            return pallas_conv3x3_s1(x, w9, cp['b'], act=act, residual=residual)
        except Exception:
            pass  # TODO(synk): fall back to im2col if the implicit-GEMM conv fails to lower
    return pallas_conv2d(x, cp['w'], cp['b'], k, k, stride, pad, act=act, residual=residual)


def pallas_maxpool2d(x, k=3, stride=2, pad=1):
    # TODO(synk): multi-slice maxpool kept; a single-pass windowed kernel would save ~5 MB HBM.
    B, H, W, C = x.shape
    xp = jnp.pad(x, ((0, 0), (pad, pad), (pad, pad), (0, 0)),
                 constant_values=-jnp.inf)
    Ho = (H + 2 * pad - k) // stride + 1
    Wo = (W + 2 * pad - k) // stride + 1
    slices = [xp[:, i:i + stride * Ho:stride, j:j + stride * Wo:stride, :]
              for i in range(k) for j in range(k)]
    return pallas_elementwise('max', *slices)


# ----------------------------------------------------------------------------
# Deterministic parameter initialization (weights pre-transposed, BN pre-folded, QKV fused)
# ----------------------------------------------------------------------------
class ParamGen:
    def __init__(self, seed=0):
        self._key = jax.random.PRNGKey(seed)
        self._n = 0

    def normal(self, shape, std):
        self._n += 1
        k = jax.random.fold_in(self._key, self._n)
        return std * jax.random.normal(k, shape, jnp.float32)


def init_linear(pg, out_f, in_f):
    w = pg.normal((out_f, in_f), 1.0 / math.sqrt(in_f))
    return {'w': w.T.astype(jnp.bfloat16), 'b': jnp.zeros((out_f,), jnp.float32)}


def init_ln(d):
    return {'g': jnp.ones((d,), jnp.float32), 'b': jnp.zeros((d,), jnp.float32)}


def init_conv_bn(pg, cout, cin, k):
    # TODO(synk): BatchNorm uses eval-mode running statistics (random init), folded into the conv.
    w = pg.normal((cout, cin, k, k), math.sqrt(2.0 / (cin * k * k)))
    g = jnp.ones((cout,), jnp.float32)
    b = jnp.zeros((cout,), jnp.float32)
    mean = jnp.zeros((cout,), jnp.float32)
    var = jnp.ones((cout,), jnp.float32)
    scale = g * jax.lax.rsqrt(var + 1e-5)
    shift = b - mean * scale
    w = w * scale[:, None, None, None]
    w2d = w.transpose(2, 3, 1, 0).reshape(k * k * cin, cout).astype(jnp.bfloat16)
    return {'w': w2d, 'b': shift, 'k': k}


def init_mha(pg, d):
    in_w = pg.normal((3 * d, d), 1.0 / math.sqrt(d))
    out_w = pg.normal((d, d), 1.0 / math.sqrt(d))
    wt = in_w.T.astype(jnp.bfloat16)                       # (d, 3d), fused QKV
    return {'w_qkv': wt, 'b_qkv': jnp.zeros((3 * d,), jnp.float32),
            'w_q': wt[:, :d], 'b_q': jnp.zeros((d,), jnp.float32),
            'w_kv': wt[:, d:], 'b_kv': jnp.zeros((2 * d,), jnp.float32),
            'w_out': out_w.T.astype(jnp.bfloat16),
            'b_out': jnp.zeros((d,), jnp.float32)}


def init_resnet34(pg):
    p = {'conv1': init_conv_bn(pg, 64, 3, 7), 'layers': []}
    cfg = [(64, 64, 3, 1), (64, 128, 4, 2), (128, 256, 6, 2), (256, 512, 3, 2)]
    for cin, cout, nblocks, stride in cfg:
        blocks = []
        for bi in range(nblocks):
            s = stride if bi == 0 else 1
            ci = cin if bi == 0 else cout
            blk = {'stride': s,
                   'c1': init_conv_bn(pg, cout, ci, 3),
                   'c2': init_conv_bn(pg, cout, cout, 3)}
            if s != 1 or ci != cout:
                blk['down'] = init_conv_bn(pg, cout, ci, 1)
            blocks.append(blk)
        p['layers'].append(blocks)
    return p


def init_encoder_layer(pg):
    return {'self_attn': init_mha(pg, EMBED),
            'linear1': init_linear(pg, ENC_DEC_FF, EMBED),
            'linear2': init_linear(pg, EMBED, ENC_DEC_FF),
            'norm1': init_ln(EMBED), 'norm2': init_ln(EMBED)}


def init_decoder_layer(pg):
    return {'self_attn': init_mha(pg, EMBED),
            'cross_attn': init_mha(pg, EMBED),
            'linear1': init_linear(pg, ENC_DEC_FF, EMBED),
            'linear2': init_linear(pg, EMBED, ENC_DEC_FF),
            'norm1': init_ln(EMBED), 'norm2': init_ln(EMBED), 'norm3': init_ln(EMBED)}


def init_bert(pg, vocab_len):
    # TODO(synk): pretrained bert-base-uncased weights replaced by deterministic random init.
    p = {'word_emb': pg.normal((vocab_len, EMBED), 0.02),
         'pos_emb': pg.normal((512, EMBED), 0.02),
         'type_emb': pg.normal((2, EMBED), 0.02),
         'emb_ln': init_ln(EMBED), 'layers': []}
    for _ in range(BERT_LAYERS):
        q = init_linear(pg, EMBED, EMBED)
        k = init_linear(pg, EMBED, EMBED)
        v = init_linear(pg, EMBED, EMBED)
        p['layers'].append({
            'w_qkv': jnp.concatenate([q['w'], k['w'], v['w']], axis=1),
            'b_qkv': jnp.concatenate([q['b'], k['b'], v['b']]),
            'o': init_linear(pg, EMBED, EMBED),
            'attn_ln': init_ln(EMBED),
            'inter': init_linear(pg, BERT_FF, EMBED),
            'out': init_linear(pg, EMBED, BERT_FF),
            'out_ln': init_ln(EMBED)})
    return p


def init_model_params(seed, vocab_len):
    pg = ParamGen(seed)
    return {'resnet': init_resnet34(pg),
            'img_linear': init_linear(pg, EMBED, 49),
            'img_encoder': [init_encoder_layer(pg) for _ in range(2)],
            'bert': init_bert(pg, vocab_len),
            'decoder': [init_decoder_layer(pg) for _ in range(2)],
            'out_linear': init_linear(pg, vocab_len, EMBED)}


# ----------------------------------------------------------------------------
# Model forward (maps the PyTorch modules 1:1)
# ----------------------------------------------------------------------------
def resnet34_forward(x, p):
    x = x.transpose(0, 2, 3, 1).astype(jnp.bfloat16)               # NCHW -> NHWC bf16
    x = conv_apply(x, p['conv1'], stride=2, pad=3, act='relu')     # 7x7/s2 stem
    x = pallas_maxpool2d(x, 3, 2, 1)
    for blocks in p['layers']:
        for blk in blocks:
            identity = x
            if 'down' in blk:
                identity = conv_apply(x, blk['down'], blk['stride'], 0)
            out = conv_apply(x, blk['c1'], blk['stride'], 1, act='relu')
            # BN + residual add + ReLU fused into conv2's epilogue.
            x = conv_apply(out, blk['c2'], 1, 1, act='relu', residual=identity)
    return x                                                       # (B, 7, 7, 512)


def mha_forward(query, kv, p, nheads, attn_bias=None, residual=None,
                self_attn=True, ln=None):
    # query: (Lq, B, E); kv: (Lk, B, E) — torch.nn.MultiheadAttention convention.
    Lq, B, E = query.shape
    Lk = kv.shape[0]
    dh = E // nheads
    qf = query.reshape(Lq * B, E)
    if self_attn:
        qkv = pallas_matmul(qf, p['w_qkv'], p['b_qkv'])            # fused QKV projection
        q2, k2, v2 = qkv[:, :E], qkv[:, E:2 * E], qkv[:, 2 * E:]
    else:
        q2 = pallas_matmul(qf, p['w_q'], p['b_q'])
        kv2 = pallas_matmul(kv.reshape(Lk * B, E), p['w_kv'], p['b_kv'])
        k2, v2 = kv2[:, :E], kv2[:, E:]

    def to_heads(t, L):
        return t.reshape(L, B, nheads, dh).transpose(1, 2, 0, 3).reshape(B * nheads, L, dh)

    q = to_heads(q2, Lq)
    k = to_heads(k2, Lk)
    v = to_heads(v2, Lk)
    o = pallas_attention(q, k, v, attn_bias, 1.0 / math.sqrt(dh))
    o = o.reshape(B, nheads, Lq, dh).transpose(2, 0, 1, 3).reshape(Lq * B, E)
    # residual add (+ LayerNorm) fused into the output-projection epilogue
    return pallas_matmul(o, p['w_out'], p['b_out'], residual=residual, ln=ln)


def encoder_layer_forward(x, p):
    L, B, E = x.shape
    xf = x.reshape(L * B, E)
    xf = mha_forward(x, x, p['self_attn'], ENC_DEC_HEADS, residual=xf,
                     ln=(p['norm1']['g'], p['norm1']['b'], 1e-5))
    h = pallas_matmul(xf, p['linear1']['w'], p['linear1']['b'], act='relu')
    xf = pallas_matmul(h, p['linear2']['w'], p['linear2']['b'], residual=xf,
                       ln=(p['norm2']['g'], p['norm2']['b'], 1e-5))
    return xf.reshape(L, B, E)


def decoder_layer_forward(x, memory, p, tgt_bias):
    L, B, E = x.shape
    xf = x.reshape(L * B, E)
    xf = mha_forward(x, x, p['self_attn'], ENC_DEC_HEADS, attn_bias=tgt_bias,
                     residual=xf, ln=(p['norm1']['g'], p['norm1']['b'], 1e-5))
    x3 = xf.reshape(L, B, E)
    xf = mha_forward(x3, memory, p['cross_attn'], ENC_DEC_HEADS,
                     residual=xf, self_attn=False,
                     ln=(p['norm2']['g'], p['norm2']['b'], 1e-5))
    h = pallas_matmul(xf, p['linear1']['w'], p['linear1']['b'], act='relu')
    xf = pallas_matmul(h, p['linear2']['w'], p['linear2']['b'], residual=xf,
                       ln=(p['norm3']['g'], p['norm3']['b'], 1e-5))
    return xf.reshape(L, B, E)


def image_forward(x, params):
    feat = resnet34_forward(x, params['resnet'])                   # (B, 7, 7, 512) NHWC
    B = feat.shape[0]
    flat = feat.transpose(0, 3, 1, 2).reshape(B * 512, 49)         # == NCHW .flatten(2)
    emb = pallas_matmul(flat, params['img_linear']['w'], params['img_linear']['b'])
    emb = emb.reshape(B, 512, EMBED).transpose(1, 0, 2)            # .permute(1, 0, 2)
    for lp in params['img_encoder']:
        emb = encoder_layer_forward(emb, lp)
    return emb                                                     # (512, B, 768)


def bert_forward(tokens_bl, p):
    B, L = tokens_bl.shape
    dh = EMBED // BERT_HEADS
    E = EMBED
    h = (p['word_emb'][tokens_bl] + p['pos_emb'][:L][None, :, :]
         + p['type_emb'][0][None, None, :])
    x2 = pallas_layernorm(h.reshape(B * L, E), p['emb_ln']['g'], p['emb_ln']['b'], 1e-12)

    def heads(t):
        return t.reshape(B, L, BERT_HEADS, dh).transpose(0, 2, 1, 3).reshape(
            B * BERT_HEADS, L, dh)

    scale = 1.0 / math.sqrt(dh)
    for lp in p['layers']:
        qkv = pallas_matmul(x2, lp['w_qkv'], lp['b_qkv'])          # fused q/k/v projection
        q = heads(qkv[:, :E])
        k = heads(qkv[:, E:2 * E])
        v = heads(qkv[:, 2 * E:])
        a = pallas_attention(q, k, v, None, scale)                 # all heads in one grid step
        a = a.reshape(B, BERT_HEADS, L, dh).transpose(0, 2, 1, 3).reshape(B * L, E)
        x2 = pallas_matmul(a, lp['o']['w'], lp['o']['b'], residual=x2,
                           ln=(lp['attn_ln']['g'], lp['attn_ln']['b'], 1e-12))
        inter = pallas_matmul(x2, lp['inter']['w'], lp['inter']['b'], act='gelu')
        x2 = pallas_matmul(inter, lp['out']['w'], lp['out']['b'], residual=x2,
                           ln=(lp['out_ln']['g'], lp['out_ln']['b'], 1e-12))
    return x2.reshape(B, L, E)


def text_forward(tokens_lb, p):
    h = bert_forward(tokens_lb.T, p)                               # (L,B) -> (B,L) -> BERT
    return h.transpose(1, 0, 2)                                    # -> (L, B, 768)


def mask_padding(tokens_lb, value):
    return (tokens_lb == value).T                                  # (B, L) bool


def mask_sequence(length):
    return jnp.triu(jnp.full((length, length), -jnp.inf, jnp.float32), k=1)


def cross_forward(image_x, text_x, params, vocab):
    memory = image_forward(image_x, params)                        # (512, B, 768)
    tgt = text_forward(text_x, params['bert'])                     # (L, B, 768)
    L, B, _ = tgt.shape
    causal = mask_sequence(L)                                      # (L, L) additive mask
    kpm = mask_padding(text_x, vocab.index('<padding>'))           # (B, L) bool
    # large-finite negative for key padding avoids all -inf rows (NaN guard)
    bias = causal[None, :, :] + jnp.where(kpm, -1e9, 0.0).astype(jnp.float32)[:, None, :]
    tgt_bias = jnp.broadcast_to(bias[:, None], (B, ENC_DEC_HEADS, L, L)).reshape(
        B * ENC_DEC_HEADS, L, L)
    x = tgt
    for lp in params['decoder']:
        x = decoder_layer_forward(x, memory, lp, tgt_bias)
    logits = pallas_matmul(x.reshape(L * B, EMBED),
                           params['out_linear']['w'], params['out_linear']['b'],
                           out_dtype=jnp.float32)
    return logits.reshape(L, B, -1)                                # (L, B, vocab)


def model_forward(batch, params, vocab, recurse=False):
    if not recurse:
        return cross_forward(batch['image'], batch['text'], params, vocab)
    # recurse=True: autoregressive generation branch of model.forward
    image_x = batch['image']
    size = batch['size']
    length = batch['max text length']
    generation = jnp.full((1, size), vocab.index('<start>'), jnp.int32)
    out_prob = None
    for i in range(length - 1):
        probs = cross_forward(image_x, generation, params, vocab)[-1, :, :]
        pred = jnp.argmax(probs, axis=1)[None, :].astype(jnp.int32)
        out_prob = probs[None] if i == 0 else jnp.concatenate([out_prob, probs[None]], 0)
        generation = jnp.concatenate([generation, pred], axis=0)
    return out_prob


class Vocabulary:
    def __init__(self, length=64):
        self.length = length
        self._index = {'<padding>': 0, '<start>': 1, '<end>': 2}

    def index(self, token):
        return self._index[token]


if __name__ == "__main__":
    vocab = Vocabulary(length=64)
    params = init_model_params(seed=0, vocab_len=vocab.length)

    key = jax.random.PRNGKey(0)
    k_img, k_txt = jax.random.split(key)
    B, L = 2, 8
    # image must be 224x224 so the ResNet34 trunk yields 7x7=49 features (Linear(49, 768)).
    image_in = jax.random.normal(k_img, (B, 3, 224, 224), jnp.float32)
    text_in = jax.random.randint(k_txt, (L, B), 3, vocab.length, dtype=jnp.int32)
    text_in = text_in.at[0, :].set(vocab.index('<start>'))
    text_in = text_in.at[-2:, 1].set(vocab.index('<padding>'))  # some <padding> tokens

    batch = {'image': image_in, 'text': text_in}
    y = model_forward(batch, params, vocab, recurse=False)
    jax.block_until_ready(y)
    assert y.shape == (L, B, vocab.length), y.shape
    assert y.dtype == jnp.float32
    print("KERNEL_OK")
</pallas_src>

<mosaic_0001>
module attributes {stable_mosaic.version = 11 : i64} {
  func.func @kernel(%arg0: i32, %arg1: i32, %arg2: i32, %arg3: memref<512x256xbf16, #tpu.memory_space<vmem>>, %arg4: memref<256x128xbf16, #tpu.memory_space<vmem>>, %arg5: memref<1x128xf32, #tpu.memory_space<vmem>>, %arg6: memref<512x128xbf16, #tpu.memory_space<vmem>>, %arg7: memref<512x128xf32, #tpu.memory_space<vmem>>) attributes {dimension_semantics = [#tpu.dimension_semantics<parallel>, #tpu.dimension_semantics<parallel>, #tpu.dimension_semantics<arbitrary>], iteration_bounds = array<i64: 49, 1, 1>, scalar_prefetch = 0 : i64, scratch_operands = 1 : i64, tpu.core_type = #tpu.core_type<tc>, window_params = [{transform_indices = @transform_0, window_bounds = array<i64: 512, 256>}, {transform_indices = @transform_1, window_bounds = array<i64: 256, 128>}, {transform_indices = @transform_2, window_bounds = array<i64: 1, 128>}, {transform_indices = @transform_3, window_bounds = array<i64: 512, 128>}]} {
    %c0_i32 = arith.constant 0 : i32
    %0 = arith.cmpi eq, %arg2, %c0_i32 : i32
    %1 = arith.extui %0 : i1 to i32
    %c0_i32_0 = arith.constant 0 : i32
    %2 = arith.cmpi ne, %1, %c0_i32_0 : i32
    scf.if %2 {
      %cst_10 = arith.constant 0.000000e+00 : f32
      %12 = vector.broadcast %cst_10 : f32 to vector<512x128xf32>
      %c0_11 = arith.constant 0 : index
      %c0_12 = arith.constant 0 : index
      %13 = vector.load %arg7[%c0_11, %c0_12] : memref<512x128xf32, #tpu.memory_space<vmem>>, vector<512x128xf32>
      tpu.vector_store %arg7[%c0_11, %c0_12], %12 {strides = array<i32>} : memref<512x128xf32, #tpu.memory_space<vmem>>, vector<512x128xf32>,
    } else {
    }
    %c0 = arith.constant 0 : index
    %c0_1 = arith.constant 0 : index
    %3 = vector.load %arg7[%c0, %c0_1] : memref<512x128xf32, #tpu.memory_space<vmem>>, vector<512x128xf32>
    %c0_2 = arith.constant 0 : index
    %c0_3 = arith.constant 0 : index
    %4 = vector.load %arg3[%c0_2, %c0_3] : memref<512x256xbf16, #tpu.memory_space<vmem>>, vector<512x256xbf16>
    %c0_4 = arith.constant 0 : index
    %c0_5 = arith.constant 0 : index
    %5 = vector.load %arg4[%c0_4, %c0_5] : memref<256x128xbf16, #tpu.memory_space<vmem>>, vector<256x128xbf16>
    %cst = arith.constant dense<0.000000e+00> : vector<512x128xf32>
    %6 = tpu.matmul %4, %5, %cst {dimension_numbers = #tpu.dot_dimension_numbers<[1], [0], [0], [1], [0, 0, 1, 1], [], []>} : vector<512x256xbf16>, vector<256x128xbf16>, vector<512x128xf32> -> vector<512x128xf32>
    %7 = arith.addf %3, %6 : vector<512x128xf32>
    %c0_6 = arith.constant 0 : index
    %c0_7 = arith.constant 0 : index
    %8 = vector.load %arg7[%c0_6, %c0_7] : memref<512x128xf32, #tpu.memory_space<vmem>>, vector<512x128xf32>
    tpu.vector_store %arg7[%c0_6, %c0_7], %7 {strides = array<i32>} : memref<512x128xf32, #tpu.memory_space<vmem>>, vector<512x128xf32>,
    %c0_i32_8 = arith.constant 0 : i32
    %9 = arith.cmpi eq, %arg2, %c0_i32_8 : i32
    %10 = arith.extui %9 : i1 to i32
    %c0_i32_9 = arith.constant 0 : i32
    %11 = arith.cmpi ne, %10, %c0_i32_9 : i32
    scf.if %11 {
      %c0_10 = arith.constant 0 : index
      %c0_11 = arith.constant 0 : index
      %12 = vector.load %arg7[%c0_10, %c0_11] : memref<512x128xf32, #tpu.memory_space<vmem>>, vector<512x128xf32>
      %c0_12 = arith.constant 0 : index
      %c0_13 = arith.constant 0 : index
      %13 = vector.load %arg5[%c0_12, %c0_13] : memref<1x128xf32, #tpu.memory_space<vmem>>, vector<1x128xf32>
      %14 = vector.broadcast %13 : vector<1x128xf32> to vector<512x128xf32>
      %15 = arith.addf %12, %14 : vector<512x128xf32>
      %cst_14 = arith.constant 0.000000e+00 : f32
      %16 = vector.broadcast %cst_14 : f32 to vector<512x128xf32>
      %17 = arith.maximumf %15, %16 : vector<512x128xf32>
      %18 = arith.truncf %17 : vector<512x128xf32> to vector<512x128xbf16>
      %c0_15 = arith.constant 0 : index
      %c0_16 = arith.constant 0 : index
      %19 = vector.load %arg6[%c0_15, %c0_16] : memref<512x128xbf16, #tpu.memory_space<vmem>>, vector<512x128xbf16>
      tpu.vector_store %arg6[%c0_15, %c0_16], %18 {strides = array<i32>} : memref<512x128xbf16, #tpu.memory_space<vmem>>, vector<512x128xbf16>,
    } else {
    }
    return
  }
  func.func @transform_0(%arg0: i32, %arg1: i32, %arg2: i32) -> (i32, i32) {
    %c0_i32 = arith.constant 0 : i32
    return %arg0, %arg2 : i32, i32
  }
  func.func @transform_1(%arg0: i32, %arg1: i32, %arg2: i32) -> (i32, i32) {
    %c0_i32 = arith.constant 0 : i32
    return %arg2, %arg1 : i32, i32
  }
  func.func @transform_2(%arg0: i32, %arg1: i32, %arg2: i32) -> (i32, i32) {
    %c0_i32 = arith.constant 0 : i32
    %c0_i32_0 = arith.constant 0 : i32
    return %c0_i32, %arg1 : i32, i32
  }
  func.func @transform_3(%arg0: i32, %arg1: i32, %arg2: i32) -> (i32, i32) {
    %c0_i32 = arith.constant 0 : i32
    return %arg0, %arg1 : i32, i32
  }
}

</mosaic_0001>

<bundles_post_ra>
// kernel: tpu_custom_call.1
= control target key start
LH: loop header
LB: loop body
LE: loop exit
PB: predicated region body
PF: predicated region fallthrough
CT: control target
= control target key end

     0   :  { %8 = vsyncpa [#allocation4], 0  ;;  %s3286_s0 = inlined_call_operand.hbm [shape: bf16[25088,256], index: 0, kind: input, shape index: {}]   ;;  %s3287_s1 = inlined_call_operand.hbm [shape: bf16[256,128], index: 1, kind: input, shape index: {}]   ;;  %s3288_s2 = inlined_call_operand.hbm [shape: f32[1,128], index: 2, kind: input, shape index: {}]   ;;  %s3289_s3 = inlined_call_operand.hbm [shape: bf16[25088,128], index: 3, kind: output, shape index: {}]  }
   0x1   :  { %10 = vsyncpa [#allocation4 + $0x1], 0 }
   0x2   :  { %11 = vsyncpa [#allocation7], 0 }
   0x3   :  { %12 = vsyncpa [#allocation5], 0 }
   0x4   :  { %14 = vsyncpa [#allocation5 + $0x1], 0  ;;  %s2839_s12 = smov 0   ;;  %s2841_s13 = smov 0  }
   0x5   :  { %s2843_s14 = smov 0   ;;  %s2845_s15 = smov 0  }
   0x6   :  { %s2847_s16 = smov 0   ;;  %s2849_s17 = smov 0  }
   0x7 LB: > { %s1977_s18 = sadd.s32 4294967295, %s2806_s17   ;;  %s1978_s19 = sadd.s32 4294967294, %s2806_s17   ;;  %s2806_s17 = sphi %s2849_s17, %s20_s17   ;;  %s2802_s16 = sphi %s2847_s16, %s3311_s16   ;;  %s2798_s15 = sphi %s2845_s15, %s3310_s15   ;;  %s2794_s14 = sphi %s2843_s14, %s3309_s14   ;;  %s2790_s13 = sphi %s2841_s13, %s3308_s13   ;;  %s2786_s12 = sphi %s2839_s12, %s3307_s12  }
   0x8   : > { %p61_p0 = scmp.ne.s32.totalorder %s2790_s13, %s2786_s12  ;;  %p2873_p1 = scmp.eq.s32.totalorder %s1977_s18, 0 }
   0x9   : > { %p2877_p2 = scmp.eq.s32.totalorder %s1977_s18, 48  ;;  %p147_p3 = scmp.eq.s32.totalorder %s1978_s19, 48 }
   0xa   : > { %s3294_s20 = scalar_select %p2873_p1, 1, 0 }
   0xb   : > { %s3295_s21 = scalar_select %p2877_p2, 1, 0 }
   0xc   : > { %p2883_p4 = por %p2873_p1, %p61_p0  ;;  %p1979_p5 = scmp.ge.s32.totalorder %s2806_s17, 1 }
   0xd   : > { %p2888_p6 = por %p147_p3, %p61_p0  ;;  %p154_p7 = scmp.lt.s32.totalorder %s2806_s17, 50 }
   0xe   : > { %s3296_s22 = scalar_select %p2883_p4, 1, 0 }
   0xf   : > { %s3297_s23 = scalar_select %p2888_p6, 1, 0 }
  0x10   : > { %p2893_p8 = pnand %p1979_p5, %p154_p7  ;;  %s2808_s25 = smov [#allocation6]  }
  0x11   : > { %s170_s26 = sshll.u32 %s2808_s25, 4  ;;  %s2809_s28 = smov [#allocation8]   ;;  %s171_s26 = int_to_ptr.vmem [resolvable:$true] %s170_s26 }
  0x12   : > { %s3298_s24 = scalar_select %p2893_p8, 1, 0 }
  0x13   : > { %p2444_p9 = pneg %p2893_p8  ;;  %s186_s29 = sshll.u32 %s2809_s28, 4  ;;  %s2905_s29 = int_to_ptr.vmem [resolvable:$true] %s186_s29 }
  0x14   : > { %s2634_s5 = scalar_lea.hbm %s3287_s1, 2048 }
  0x15   : > { %p2901_p10 = pnand %p2444_p9, %p2873_p1  ;;  %p2635_p11 = scmp.ne.s32.totalorder %s3287_s1, %s2634_s5 }
  0x16   : > { %p2641_p3 = scmp.lt.u32.totalorder %s2634_s5, %s3287_s1 }
  0x17   : > { %p2636_p12 = pneg %p2901_p10 }
  0x19   : > { %p2637_p13 = pnand %p2636_p12, %p2635_p11 }
  0x1b   : > { %p2638_p0 = pneg %p2637_p13 }
  0x1d   : > { %p2643_p5 = pnand %p2641_p3, %p2638_p0 }
  0x1f   : > { %2646 = shalt.err (!%p2643_p5)
}
  0x20   : > { %s2647_s10 = scalar_lea.vmem %s171_s26, 2048  ;;  %p2655_p1 = scmp.lt.s32.totalorder %s171_s26, %s171_s26 }
  0x21   : > { %p2648_p7 = scmp.ne.s32.totalorder %s171_s26, %s2647_s10  ;;  %p2656_p4 = scmp.lt.s32.totalorder %s2647_s10, %s2647_s10 }
  0x23   : > { %p2650_p9 = pnand %p2648_p7, %p2636_p12  ;;  %p2657_p8 = por %p2656_p4, %p2655_p1 }
  0x25   : > { %p2651_p6 = pneg %p2650_p9 }
  0x27   : > { %p2658_p2 = pnand %p2657_p8, %p2651_p6 }
  0x29   : > { %2661 = shalt.err (!%p2658_p2)
}
  0x2a   : > { %s2810_s11 = smov 64   ;;  %s2811_s18 = smov 4  }
  0x2b   : > { %2447 = dma.hbm_to_vmem [thread:$0]  (!%p2901_p10), %s3287_s1, 2048, %s171_s26, [#allocation7], %s2810_s11, %s2810_s11, %s2811_s18  }
  0x2c   : > { %s2662_s4 = scalar_lea.hbm %s3288_s2, 16 }
  0x2d   : > { %p2663_p11 = scmp.ne.s32.totalorder %s3288_s2, %s2662_s4  ;;  %p2669_p4 = scmp.lt.u32.totalorder %s2662_s4, %s3288_s2 }
  0x2f   : > { %p2665_p1 = pnand %p2663_p11, %p2636_p12 }
  0x31   : > { %p2666_p2 = pneg %p2665_p1 }
  0x33   : > { %p2671_p6 = pnand %p2669_p4, %p2666_p2 }
  0x35   : > { %2674 = shalt.err (!%p2671_p6)
}
  0x36   : > { %s2675_s26 = scalar_lea.vmem %s2905_s29, 16  ;;  %s2682_s9 = scalar_lea.vmem %s2905_s29, 32 }
  0x37   : > { %p2676_p8 = scmp.ne.s32.totalorder %s2905_s29, %s2675_s26  ;;  %p2683_p3 = scmp.lt.s32.totalorder %s2905_s29, %s2905_s29 }
  0x38   : > { %p2684_p5 = scmp.lt.s32.totalorder %s2682_s9, %s2675_s26 }
  0x39   : > { %p2678_p13 = pnand %p2676_p8, %p2636_p12 }
  0x3a   : > { %p2685_p7 = por %p2684_p5, %p2683_p3 }
  0x3b   : > { %p2679_p0 = pneg %p2678_p13 }
  0x3d   : > { %p2686_p9 = pnand %p2685_p7, %p2679_p0 }
  0x3f   : > { %2689 = shalt.err (!%p2686_p9)
}
  0x40   : > { %2450 = dma.hbm_to_vmem [thread:$0]  (!%p2901_p10), %s3288_s2, 16, %s2905_s29, [#allocation7]  }
  0x41   : > { %s39_s18 = sadd.s32 1, %s2802_s16  ;;  %s48_s19 = sadd.s32 1, %s2794_s14 }
  0x42   : > { %p41_p12 = scmp.ge.s32.totalorder %s39_s18, 49  ;;  %p55_p11 = scmp.ne.s32.totalorder %s2794_s14, %s2790_s13 }
  0x43   : > { %p56_p1 = scmp.eq.s32.totalorder %s2806_s17, 0  ;;  %p2461_p2 = scmp.lt.s32.totalorder %s2806_s17, 49 }
  0x44   : > { %s3313_s18 = smov (%p41_p12, %s39_s18), 0  ;;  %p3300_p6 = scmp.ne.s32.totalorder %s3295_s21, 0 }
  0x45   : > { %p57_p4 = por %p56_p1, %p55_p11  ;;  %s43_s25 = ssub.s32 %s2802_s16, %s3313_s18 }
  0x46   : > { %p2965_p8 = por %p3300_p6, %p55_p11  ;;  %s197_s28 = sand.u32 1, %s2794_s14  }
  0x47   : > { %p46_p13 = scmp.eq.s32.totalorder %s43_s25, 0  ;;  %s1983_s29 = sshll.u32 %s197_s28, 9 }
  0x48   : > { %s2143_s30 = sshll.u32 %s2802_s16, 13  ;;  %s201_s21 = scalar_lea.vmem [#allocation3], %s1983_s29 }
  0x49   : > { %s2974_s4 = scalar_select %p46_p13, %s2794_s14, %s48_s19  }
  0x4a   : > { %s2979_s7 = scalar_lea.hbm %s3286_s0, %s2143_s30  ;;  %s211_s8 = sshll.u32 %s201_s21, 4  ;;  %s2987_s8 = int_to_ptr.vmem [resolvable:$true] %s211_s8 }
  0x4b   : > { %p2983_p10 = pnand %p2461_p2, %p57_p4  ;;  %s2989_s9 = scalar_lea.sflag [#allocation4], %s197_s28 }
  0x4c   : > { %s2690_s10 = scalar_lea.hbm %s2979_s7, 8192  ;;  %s2695_s25 = scalar_lea.hbm %s3286_s0, 401408 }
  0x4d   : > { %p2691_p0 = scmp.ne.s32.totalorder %s2979_s7, %s2690_s10  ;;  %p2692_p3 = pneg %p2983_p10 }
  0x4e   : > { %p2696_p9 = scmp.lt.u32.totalorder %s2979_s7, %s3286_s0  ;;  %p2697_p12 = scmp.lt.u32.totalorder %s2695_s25, %s2690_s10 }
  0x4f   : > { %p2693_p5 = pnand %p2692_p3, %p2691_p0  ;;  %p2699_p1 = scmp.lt.u32.totalorder %s2690_s10, %s2979_s7 }
  0x50   : > { %p2698_p11 = por %p2697_p12, %p2696_p9 }
  0x51   : > { %p2694_p7 = pneg %p2693_p5 }
  0x52   : > { %p2700_p2 = por %p2699_p1, %p2698_p11 }
  0x54   : > { %p2701_p4 = pnand %p2700_p2, %p2694_p7 }
  0x56   : > { %2704 = shalt.err (!%p2701_p4)
}
  0x57   : > { %s2705_s28 = scalar_lea.vmem %s2987_s8, 8192  ;;  %s2812_s5 = smov [#allocation3]  }
  0x58   : > { %p2706_p6 = scmp.ne.s32.totalorder %s2987_s8, %s2705_s28  ;;  %s2710_s6 = sshll.u32 %s2812_s5, 4  ;;  %s2711_s6 = int_to_ptr.vmem [resolvable:$false] %s2710_s6 }
  0x59   : > { %s2712_s21 = scalar_lea.vmem %s2711_s6, 16384  ;;  %p2713_p5 = scmp.lt.s32.totalorder %s2987_s8, %s2711_s6 }
  0x5a   : > { %p2708_p13 = pnand %p2706_p6, %p2692_p3  ;;  %p2714_p9 = scmp.lt.s32.totalorder %s2712_s21, %s2705_s28 }
  0x5c   : > { %p2709_p0 = pneg %p2708_p13  ;;  %p2715_p12 = por %p2714_p9, %p2713_p5 }
  0x5e   : > { %p2716_p11 = pnand %p2715_p12, %p2709_p0 }
  0x60   : > { %2719 = shalt.err (!%p2716_p11)
}
  0x61   : > { %s2813_s10 = smov 128   ;;  %s2814_s11 = smov 8  }
  0x62   : > { %2454 = dma.hbm_to_vmem [thread:$0]  (!%p2983_p10), %s2979_s7, 8192, %s2987_s8, %s2989_s9, %s2813_s10, %s2813_s10, %s2814_s11  }
  0x63   : > { %p3303_p3 = scmp.ne.s32.totalorder %s3298_s24, 0 }
  0x64   : > { %s3020_s19 = sand.u32 (!%p3303_p3), 1, %s2790_s13   ;;  %p3304_p7 = scmp.ne.s32.totalorder (!%p3303_p3), %s3296_s22, 0 }
  0x65   : > { %223 = sbr.rel (%p3303_p3) target bundleno = 532 (0x214), region = 32  ;;  %s1988_s25 = sshll.u32 (!%p3303_p3), %s3020_s19, 9 }
  0x66   : > { %s226_s29 = scalar_lea.sflag (!%p3303_p3), [#allocation4], %s3020_s19  ;;  %s3024_s30 = scalar_lea.vmem (!%p3303_p3), [#allocation3], %s1988_s25 }
  0x6c   : > { %2773 = dma.done.wait (%p3304_p7), %s226_s29, 8192  }
  0x6d   : > { %2775 = vsyncadd (%p3304_p7), %s226_s29, 4294959104  ;;  %p3305_p10 = scmp.ne.s32.totalorder %s3294_s20, 0 }
  0x6f   : > { %2777 = dma.done.wait (%p3305_p10), [#allocation7], 2064  }
  0x70   : > { %2779 = vsyncadd (%p3305_p10), [#allocation7], 4294965232  ;;  %v2815_v0 = vmov 0   ;;  %v2522_v1 = vld [vmem:[#allocation6] sm:$0xff]   ;;  %v2523_v2 = vld [vmem:[#allocation6 + $0x8] sm:$0xff]   ;;  %s1991_s20 = sshll.u32 %s3020_s19, 8 }
  0x71   : > { %909 = vmatprep.subr.bf16.mxu0 %v2815_v0  ;;  %2400 = vmatprep.subr.bf16.mxu1 %v2815_v0  ;;  %v2524_v3 = vld [vmem:[#allocation6 + $0x10] sm:$0xff]   ;;  %v2525_v4 = vld [vmem:[#allocation6 + $0x18] sm:$0xff]   ;;  %v2526_v5 = vld [vmem:[#allocation6 + $0x20] sm:$0xff]   ;;  %s3137_s22 = scalar_lea.vmem [#allocation9], %s1991_s20  ;;  %s2208_s24 = sshll.u32 %s2798_s15, 12 }
  0x72   : > { %910 = vmatpush1.bf16.msra.mxu0 %v2522_v1  ;;  %2416 = vmatpush1.bf16.msra.mxu1 %v2522_v1  ;;  %v2540_v6 = vld [vmem:[%s3024_s30 + $0x4] ss:$8 sps:$4 sm:$0xff]   ;;  %v2528_v9 = vld [vmem:[#allocation6 + $0x30] sm:$0xff]   ;;  %v2529_v10 = vld [vmem:[#allocation6 + $0x38] sm:$0xff]   ;;  %s1863_s7 = sshll.u32 %s3137_s22, 4  ;;  %s3234_s9 = scalar_lea.hbm %s3289_s3, %s2208_s24  ;;  %s3236_s7 = int_to_ptr.vmem [resolvable:$true] %s1863_s7 }
  0x73   : > { %911 = vmatprep.subr.bf16.mxu0 %v2815_v0  ;;  %2401 = vmatprep.subr.bf16.mxu1 %v2815_v0  ;;  %v2527_v7 = vld [vmem:[#allocation6 + $0x28] sm:$0xff]   ;;  %v2530_v11 = vld [vmem:[#allocation6 + $0x40] sm:$0xff]   ;;  %v2532_v13 = vld [vmem:[#allocation6 + $0x50] sm:$0xff]   ;;  %s1849_s15 = scalar_lea.sflag [#allocation5], %s3020_s19  ;;  %s2720_s28 = scalar_lea.vmem %s3236_s7, 4096 }
  0x74   : > { %v2543_v8 = vld [vmem:[%s3024_s30 + $0x104] ss:$8 sps:$4 sm:$0xff]   ;;  %941 = vmatprep.mubr.bf16.mxu0 %v2540_v6  ;;  %v2533_v14 = vld [vmem:[#allocation6 + $0x58] sm:$0xff]   ;;  %v2536_v17 = vld [vmem:[#allocation6 + $0x70] sm:$0xff]   ;;  %p2721_p1 = scmp.ne.s32.totalorder %s3236_s7, %s2720_s28  ;;  %s2816_s5 = smov [#allocation9]  }
  0x75   : > { %1069 = vmatprep.mubr.bf16.mxu1 %v2543_v8  ;;  %v2531_v12 = vld [vmem:[#allocation6 + $0x48] sm:$0xff]   ;;  %v2534_v15 = vld [vmem:[#allocation6 + $0x60] sm:$0xff]   ;;  %v2537_v18 = vld [vmem:[#allocation6 + $0x78] sm:$0xff]   ;;  %s2724_s6 = sshll.u32 %s2816_s5, 4  ;;  %s2725_s6 = int_to_ptr.vmem [resolvable:$false] %s2724_s6 }
  0x76   : > { %912 = vmatpush1.bf16.msra.mxu0 %v2523_v2  ;;  %2417 = vmatpush1.bf16.msra.mxu1 %v2523_v2  ;;  %v2535_v16 = vld [vmem:[#allocation6 + $0x68] sm:$0xff]   ;;  %v2544_v21 = vld [vmem:[%s3024_s30 + $0x14] ss:$8 sps:$4 sm:$0xff]   ;;  %v2548_v23 = vld [vmem:[%s3024_s30 + $0x10] ss:$8 sps:$4 sm:$0xff]   ;;  %p2722_p2 = pnand %p2721_p1, %p2965_p8  ;;  %s2726_s21 = scalar_lea.vmem %s2725_s6, 8192 }
  0x77   : > { %913 = vmatprep.subr.bf16.mxu0 %v2815_v0  ;;  %2402 = vmatprep.subr.bf16.mxu1 %v2815_v0  ;;  %v2538_v19 = vld [vmem:[%s3024_s30] ss:$8 sps:$4 sm:$0xff]   ;;  %v2546_v22 = vld [vmem:[%s3024_s30 + $0x114] ss:$8 sps:$4 sm:$0xff]   ;;  %v2549_v24 = vld [vmem:[%s3024_s30 + $0x110] ss:$8 sps:$4 sm:$0xff]   ;;  %p2727_p6 = scmp.lt.s32.totalorder %s3236_s7, %s2725_s6  ;;  %p2728_p13 = scmp.lt.s32.totalorder %s2726_s21, %s2720_s28 }
  0x78   : > { %v2541_v20 = vld [vmem:[%s3024_s30 + $0x100] ss:$8 sps:$4 sm:$0xff]   ;;  %v2550_v25 = vld [vmem:[%s3024_s30 + $0x24] ss:$8 sps:$4 sm:$0xff]   ;;  %v2556_v29 = vld [vmem:[%s3024_s30 + $0x34] ss:$8 sps:$4 sm:$0xff]   ;;  %p2723_p4 = pneg %p2722_p2 }
  0x79   : > { %v2552_v26 = vld [vmem:[%s3024_s30 + $0x124] ss:$8 sps:$4 sm:$0xff]   ;;  %v2554_v27 = vld [vmem:[%s3024_s30 + $0x20] ss:$8 sps:$4 sm:$0xff]   ;;  %v2558_v30 = vld [vmem:[%s3024_s30 + $0x134] ss:$8 sps:$4 sm:$0xff]   ;;  %p2729_p0 = por %p2728_p13, %p2727_p6 }
  0x7a   : > { %914 = vmatpush1.bf16.msra.mxu0 %v2524_v3  ;;  %2418 = vmatpush1.bf16.msra.mxu1 %v2524_v3  ;;  %v2555_v28 = vld [vmem:[%s3024_s30 + $0x120] ss:$8 sps:$4 sm:$0xff]   ;;  %v2560_v31 = vld [vmem:[%s3024_s30 + $0x30] ss:$8 sps:$4 sm:$0xff]   ;;  %v2562_v33 = vld [vmem:[%s3024_s30 + $0x44] ss:$8 sps:$4 sm:$0xff]  }
  0x7b   : > { %915 = vmatprep.subr.bf16.mxu0 %v2815_v0  ;;  %2403 = vmatprep.subr.bf16.mxu1 %v2815_v0  ;;  %v2561_v32 = vld [vmem:[%s3024_s30 + $0x130] ss:$8 sps:$4 sm:$0xff]   ;;  %v2564_v34 = vld [vmem:[%s3024_s30 + $0x144] ss:$8 sps:$4 sm:$0xff]   ;;  %v2566_v35 = vld [vmem:[%s3024_s30 + $0x40] ss:$8 sps:$4 sm:$0xff]   ;;  %p2730_p5 = pnand %p2729_p0, %p2723_p4 }
  0x7c   : > { %v2567_v36 = vld [vmem:[%s3024_s30 + $0x140] ss:$8 sps:$4 sm:$0xff]   ;;  %v2568_v37 = vld [vmem:[%s3024_s30 + $0x54] ss:$8 sps:$4 sm:$0xff]   ;;  %v2572_v39 = vld [vmem:[%s3024_s30 + $0x50] ss:$8 sps:$4 sm:$0xff]  }
  0x7d   : > { %v2570_v38 = vld [vmem:[%s3024_s30 + $0x154] ss:$8 sps:$4 sm:$0xff]   ;;  %v2573_v40 = vld [vmem:[%s3024_s30 + $0x150] ss:$8 sps:$4 sm:$0xff]   ;;  %v2574_v41 = vld [vmem:[%s3024_s30 + $0x64] ss:$8 sps:$4 sm:$0xff]  }
  0x7e   : > { %916 = vmatpush1.bf16.msra.mxu0 %v2525_v4  ;;  %2419 = vmatpush1.bf16.msra.mxu1 %v2525_v4  ;;  %v2576_v42 = vld [vmem:[%s3024_s30 + $0x164] ss:$8 sps:$4 sm:$0xff]   ;;  %v2578_v43 = vld [vmem:[%s3024_s30 + $0x60] ss:$8 sps:$4 sm:$0xff]   ;;  %v2580_v45 = vld [vmem:[%s3024_s30 + $0x74] ss:$8 sps:$4 sm:$0xff]  }
  0x7f   : > { %917 = vmatprep.subr.bf16.mxu0 %v2815_v0  ;;  %2404 = vmatprep.subr.bf16.mxu1 %v2815_v0  ;;  %v2579_v44 = vld [vmem:[%s3024_s30 + $0x160] ss:$8 sps:$4 sm:$0xff]   ;;  %v2582_v46 = vld [vmem:[%s3024_s30 + $0x174] ss:$8 sps:$4 sm:$0xff]   ;;  %v2584_v47 = vld [vmem:[%s3024_s30 + $0x70] ss:$8 sps:$4 sm:$0xff]  }
  0x80   : > { %v2585_v48 = vld [vmem:[%s3024_s30 + $0x170] ss:$8 sps:$4 sm:$0xff]   ;;  %v2586_v49 = vld [vmem:[%s3024_s30 + $0x84] ss:$8 sps:$4 sm:$0xff]   ;;  %v2590_v51 = vld [vmem:[%s3024_s30 + $0x80] ss:$8 sps:$4 sm:$0xff]  }
  0x81   : > { %v2588_v50 = vld [vmem:[%s3024_s30 + $0x184] ss:$8 sps:$4 sm:$0xff]   ;;  %v2591_v52 = vld [vmem:[%s3024_s30 + $0x180] ss:$8 sps:$4 sm:$0xff]   ;;  %v2592_v53 = vld [vmem:[%s3024_s30 + $0x94] ss:$8 sps:$4 sm:$0xff]  }
  0x82   : > { %918 = vmatpush1.bf16.msra.mxu0 %v2526_v5  ;;  %2420 = vmatpush1.bf16.msra.mxu1 %v2526_v5  ;;  %v2594_v54 = vld [vmem:[%s3024_s30 + $0x194] ss:$8 sps:$4 sm:$0xff]   ;;  %v2596_v55 = vld [vmem:[%s3024_s30 + $0x90] ss:$8 sps:$4 sm:$0xff]   ;;  %v2598_v57 = vld [vmem:[%s3024_s30 + $0xa4] ss:$8 sps:$4 sm:$0xff]  }
  0x83   : > { %919 = vmatprep.subr.bf16.mxu0 %v2815_v0  ;;  %2405 = vmatprep.subr.bf16.mxu1 %v2815_v0  ;;  %v2597_v56 = vld [vmem:[%s3024_s30 + $0x190] ss:$8 sps:$4 sm:$0xff]   ;;  %v2600_v58 = vld [vmem:[%s3024_s30 + $0x1a4] ss:$8 sps:$4 sm:$0xff]   ;;  %v2602_v59 = vld [vmem:[%s3024_s30 + $0xa0] ss:$8 sps:$4 sm:$0xff]  }
  0x84   : > { %v2603_v60 = vld [vmem:[%s3024_s30 + $0x1a0] ss:$8 sps:$4 sm:$0xff]   ;;  %v2604_v61 = vld [vmem:[%s3024_s30 + $0xb4] ss:$8 sps:$4 sm:$0xff]   ;;  %v2608_v63 = vld [vmem:[%s3024_s30 + $0xb0] ss:$8 sps:$4 sm:$0xff]  }
  0x85   : > { %v2606_v62 = vld [vmem:[%s3024_s30 + $0x1b4] ss:$8 sps:$4 sm:$0xff]   ;;  %v2610_v1 = vld [vmem:[%s3024_s30 + $0xc4] ss:$8 sps:$4 sm:$0xff]   ;;  %v2614_v3 = vld [vmem:[%s3024_s30 + $0xc0] ss:$8 sps:$4 sm:$0xff]  }
  0x86   : > { %920 = vmatpush1.bf16.msra.mxu0 %v2527_v7  ;;  %2421 = vmatpush1.bf16.msra.mxu1 %v2527_v7  ;;  %v2612_v2 = vld [vmem:[%s3024_s30 + $0x1c4] ss:$8 sps:$4 sm:$0xff]   ;;  %v2615_v4 = vld [vmem:[%s3024_s30 + $0x1c0] ss:$8 sps:$4 sm:$0xff]   ;;  %v2616_v5 = vld [vmem:[%s3024_s30 + $0xd4] ss:$8 sps:$4 sm:$0xff]  }
  0x87   : > { %921 = vmatprep.subr.bf16.mxu0 %v2815_v0  ;;  %2406 = vmatprep.subr.bf16.mxu1 %v2815_v0  ;;  %v2618_v6 = vld [vmem:[%s3024_s30 + $0x1d4] ss:$8 sps:$4 sm:$0xff]   ;;  %v2620_v7 = vld [vmem:[%s3024_s30 + $0xd0] ss:$8 sps:$4 sm:$0xff]  }
  0x88   : > { %v2621_v8 = vld [vmem:[%s3024_s30 + $0x1d0] ss:$8 sps:$4 sm:$0xff]  }
  0x8a   : > { %922 = vmatpush1.bf16.msra.mxu0 %v2528_v9  ;;  %2422 = vmatpush1.bf16.msra.mxu1 %v2528_v9  ;;  %v2622_v9 = vld [vmem:[%s3024_s30 + $0xe4] ss:$8 sps:$4 sm:$0xff]  }
  0x8b   : > { %923 = vmatprep.subr.bf16.mxu0 %v2815_v0  ;;  %2407 = vmatprep.subr.bf16.mxu1 %v2815_v0 }
  0x8e   : > { %924 = vmatpush1.bf16.msra.mxu0 %v2529_v10  ;;  %2423 = vmatpush1.bf16.msra.mxu1 %v2529_v10  ;;  %v2624_v10 = vld [vmem:[%s3024_s30 + $0x1e4] ss:$8 sps:$4 sm:$0xff]  }
  0x8f   : > { %925 = vmatprep.subr.bf16.mxu0 %v2815_v0  ;;  %2408 = vmatprep.subr.bf16.mxu1 %v2815_v0 }
  0x92   : > { %926 = vmatpush1.bf16.msra.mxu0 %v2530_v11  ;;  %2424 = vmatpush1.bf16.msra.mxu1 %v2530_v11  ;;  %v2626_v11 = vld [vmem:[%s3024_s30 + $0xe0] ss:$8 sps:$4 sm:$0xff]  }
  0x93   : > { %927 = vmatprep.subr.bf16.mxu0 %v2815_v0  ;;  %2409 = vmatprep.subr.bf16.mxu1 %v2815_v0 }
  0x96   : > { %928 = vmatpush1.bf16.msra.mxu0 %v2531_v12  ;;  %2425 = vmatpush1.bf16.msra.mxu1 %v2531_v12  ;;  %v2627_v12 = vld [vmem:[%s3024_s30 + $0x1e0] ss:$8 sps:$4 sm:$0xff]  }
  0x97   : > { %929 = vmatprep.subr.bf16.mxu0 %v2815_v0  ;;  %2410 = vmatprep.subr.bf16.mxu1 %v2815_v0 }
  0x9a   : > { %930 = vmatpush1.bf16.msra.mxu0 %v2532_v13  ;;  %2426 = vmatpush1.bf16.msra.mxu1 %v2532_v13  ;;  %v2628_v13 = vld [vmem:[%s3024_s30 + $0xf4] ss:$8 sps:$4 sm:$0xff]  }
  0x9b   : > { %931 = vmatprep.subr.bf16.mxu0 %v2815_v0  ;;  %2411 = vmatprep.subr.bf16.mxu1 %v2815_v0 }
  0x9e   : > { %932 = vmatpush1.bf16.msra.mxu0 %v2533_v14  ;;  %2427 = vmatpush1.bf16.msra.mxu1 %v2533_v14  ;;  %v2630_v14 = vld [vmem:[%s3024_s30 + $0x1f4] ss:$8 sps:$4 sm:$0xff]  }
  0x9f   : > { %933 = vmatprep.subr.bf16.mxu0 %v2815_v0  ;;  %2412 = vmatprep.subr.bf16.mxu1 %v2815_v0 }
  0xa2   : > { %934 = vmatpush1.bf16.msra.mxu0 %v2534_v15  ;;  %2428 = vmatpush1.bf16.msra.mxu1 %v2534_v15  ;;  %v2632_v15 = vld [vmem:[%s3024_s30 + $0xf0] ss:$8 sps:$4 sm:$0xff]  }
  0xa3   : > { %935 = vmatprep.subr.bf16.mxu0 %v2815_v0  ;;  %2413 = vmatprep.subr.bf16.mxu1 %v2815_v0 }
  0xa6   : > { %936 = vmatpush1.bf16.msra.mxu0 %v2535_v16  ;;  %2429 = vmatpush1.bf16.msra.mxu1 %v2535_v16  ;;  %v2633_v16 = vld [vmem:[%s3024_s30 + $0x1f0] ss:$8 sps:$4 sm:$0xff]  }
  0xa7   : > { %937 = vmatprep.subr.bf16.mxu0 %v2815_v0  ;;  %2414 = vmatprep.subr.bf16.mxu1 %v2815_v0 }
  0xaa   : > { %938 = vmatpush1.bf16.msra.mxu0 %v2536_v17  ;;  %2430 = vmatpush1.bf16.msra.mxu1 %v2536_v17  ;;  %v3130_v17 = vld [vmem:[#allocation8] ss:$0 sm:$0xff] }
  0xab   : > { %939 = vmatprep.subr.bf16.mxu0 %v2815_v0  ;;  %2415 = vmatprep.subr.bf16.mxu1 %v2815_v0  ;;  %v2609_v0 = vld [vmem:[%s3024_s30 + $0x1b0] ss:$8 sps:$4 sm:$0xff]  }
  0xae   : > { %940 = vmatpush1.bf16.msra.mxu0 %v2537_v18  ;;  %2431 = vmatpush1.bf16.msra.mxu1 %v2537_v18 }
  0xb1   : > { %942 = vmatmul.mubr.bf16.vlgmr.msra.gmra.mrb[0].mxu0 %v2538_v19  ;;  %1070 = vmatmul.mubr.bf16.vlgmr.msra.gmra.mrb[0].mxu1 %v2541_v20 }
  0xb2   : > { %949 = vmatprep.mubr.bf16.mxu0 %v2544_v21  ;;  %1077 = vmatprep.mubr.bf16.mxu1 %v2546_v22 }
  0xb9   : > { %950 = vmatmul.mubr.bf16.gmra.mrb[4].mxu0 %v2548_v23  ;;  %1078 = vmatmul.mubr.bf16.gmra.mrb[4].mxu1 %v2549_v24 }
  0xba   : > { %957 = vmatprep.mubr.bf16.mxu0 %v2550_v25  ;;  %1085 = vmatprep.mubr.bf16.mxu1 %v2552_v26 }
  0xc1   : > { %958 = vmatmul.mubr.bf16.gmra.mrb[8].mxu0 %v2554_v27  ;;  %1086 = vmatmul.mubr.bf16.gmra.mrb[8].mxu1 %v2555_v28 }
  0xc2   : > { %965 = vmatprep.mubr.bf16.mxu0 %v2556_v29  ;;  %1093 = vmatprep.mubr.bf16.mxu1 %v2558_v30 }
  0xc9   : > { %966 = vmatmul.mubr.bf16.gmra.mrb[12].mxu0 %v2560_v31  ;;  %1094 = vmatmul.mubr.bf16.gmra.mrb[12].mxu1 %v2561_v32 }
  0xca   : > { %973 = vmatprep.mubr.bf16.mxu0 %v2562_v33  ;;  %1101 = vmatprep.mubr.bf16.mxu1 %v2564_v34 }
  0xd1   : > { %974 = vmatmul.mubr.bf16.gmra.mrb[16].mxu0 %v2566_v35  ;;  %1102 = vmatmul.mubr.bf16.gmra.mrb[16].mxu1 %v2567_v36 }
  0xd2   : > { %981 = vmatprep.mubr.bf16.mxu0 %v2568_v37  ;;  %1109 = vmatprep.mubr.bf16.mxu1 %v2570_v38 }
  0xd9   : > { %982 = vmatmul.mubr.bf16.gmra.mrb[20].mxu0 %v2572_v39  ;;  %1110 = vmatmul.mubr.bf16.gmra.mrb[20].mxu1 %v2573_v40 }
  0xda   : > { %989 = vmatprep.mubr.bf16.mxu0 %v2574_v41  ;;  %1117 = vmatprep.mubr.bf16.mxu1 %v2576_v42 }
  0xe1   : > { %990 = vmatmul.mubr.bf16.gmra.mrb[24].mxu0 %v2578_v43  ;;  %1118 = vmatmul.mubr.bf16.gmra.mrb[24].mxu1 %v2579_v44 }
  0xe2   : > { %997 = vmatprep.mubr.bf16.mxu0 %v2580_v45  ;;  %1125 = vmatprep.mubr.bf16.mxu1 %v2582_v46 }
  0xe9   : > { %998 = vmatmul.mubr.bf16.gmra.mrb[28].mxu0 %v2584_v47  ;;  %1126 = vmatmul.mubr.bf16.gmra.mrb[28].mxu1 %v2585_v48 }
  0xea   : > { %1005 = vmatprep.mubr.bf16.mxu0 %v2586_v49  ;;  %1133 = vmatprep.mubr.bf16.mxu1 %v2588_v50 }
  0xf1   : > { %1006 = vmatmul.mubr.bf16.gmra.mrb[32].mxu0 %v2590_v51  ;;  %1134 = vmatmul.mubr.bf16.gmra.mrb[32].mxu1 %v2591_v52 }
  0xf2   : > { %1013 = vmatprep.mubr.bf16.mxu0 %v2592_v53  ;;  %1141 = vmatprep.mubr.bf16.mxu1 %v2594_v54 }
  0xf9   : > { %1014 = vmatmul.mubr.bf16.gmra.mrb[36].mxu0 %v2596_v55  ;;  %1142 = vmatmul.mubr.bf16.gmra.mrb[36].mxu1 %v2597_v56 }
  0xfa   : > { %1021 = vmatprep.mubr.bf16.mxu0 %v2598_v57  ;;  %1149 = vmatprep.mubr.bf16.mxu1 %v2600_v58 }
 0x101   : > { %1022 = vmatmul.mubr.bf16.gmra.mrb[40].mxu0 %v2602_v59  ;;  %1150 = vmatmul.mubr.bf16.gmra.mrb[40].mxu1 %v2603_v60 }
 0x102   : > { %1029 = vmatprep.mubr.bf16.mxu0 %v2604_v61  ;;  %1157 = vmatprep.mubr.bf16.mxu1 %v2606_v62 }
 0x109   : > { %1030 = vmatmul.mubr.bf16.gmra.mrb[44].mxu0 %v2608_v63  ;;  %1158 = vmatmul.mubr.bf16.gmra.mrb[44].mxu1 %v2609_v0 }
 0x10a   : > { %1037 = vmatprep.mubr.bf16.mxu0 %v2610_v1  ;;  %1165 = vmatprep.mubr.bf16.mxu1 %v2612_v2 }
 0x111   : > { %1038 = vmatmul.mubr.bf16.gmra.mrb[48].mxu0 %v2614_v3  ;;  %1166 = vmatmul.mubr.bf16.gmra.mrb[48].mxu1 %v2615_v4 }
 0x112   : > { %1045 = vmatprep.mubr.bf16.mxu0 %v2616_v5  ;;  %1173 = vmatprep.mubr.bf16.mxu1 %v2618_v6 }
 0x119   : > { %1046 = vmatmul.mubr.bf16.gmra.mrb[52].mxu0 %v2620_v7  ;;  %1174 = vmatmul.mubr.bf16.gmra.mrb[52].mxu1 %v2621_v8 }
 0x11a   : > { %1053 = vmatprep.mubr.bf16.mxu0 %v2622_v9  ;;  %1181 = vmatprep.mubr.bf16.mxu1 %v2624_v10 }
 0x121   : > { %1054 = vmatmul.mubr.bf16.gmra.mrb[56].mxu0 %v2626_v11  ;;  %1182 = vmatmul.mubr.bf16.gmra.mrb[56].mxu1 %v2627_v12 }
 0x122   : > { %1061 = vmatprep.mubr.bf16.mxu0 %v2628_v13  ;;  %1189 = vmatprep.mubr.bf16.mxu1 %v2630_v14 }
 0x129   : > { %1062 = vmatmul.mubr.bf16.gmra.mrb[60].mxu0 %v2632_v15  ;;  %1190 = vmatmul.mubr.bf16.gmra.mrb[60].mxu1 %v2633_v16 }
 0x184   : > { %v943_v18 = vpop.f32.mrb[0].mxu0  ;;  %v1071_v19 = vpop.f32.mrb[0].mxu1 }
 0x185   : > { %v1400_v20 = vadd.f32 %v3130_v17, %v943_v18  ;;  %v1432_v21 = vadd.f32 %v3130_v17, %v1071_v19  ;;  %v945_v22 = vpop.f32.mrb[1].mxu0  ;;  %v1073_v23 = vpop.f32.mrb[1].mxu1 }
 0x186   : > { %v946_v24 = vpop.f32.mrb[2].mxu0  ;;  %v1074_v25 = vpop.f32.mrb[2].mxu1 }
 0x187   : > { %v1401_v26 = vadd.f32 %v3130_v17, %v946_v24  ;;  %v1433_v27 = vadd.f32 %v3130_v17, %v1074_v25  ;;  %v948_v28 = vpop.f32.mrb[3].mxu0  ;;  %v1076_v29 = vpop.f32.mrb[3].mxu1  ;;  %v1464_v30 = vmax.f32 %v1400_v20, 0.0  ;;  %v1496_v31 = vmax.f32 %v1432_v21, 0.0 }
 0x189   : > { %v1465_v32 = vmax.f32 %v1401_v26, 0.0  ;;  %v1497_v33 = vmax.f32 %v1433_v27, 0.0 }
 0x18b   : > { %v2212_v34 = vpack.c.bf16 %v1465_v32, %v1464_v30  ;;  %v2292_v35 = vpack.c.bf16 %v1497_v33, %v1496_v31 }
 0x18c   : > { %v951_v36 = vpop.f32.mrb[4].mxu0  ;;  %v1079_v37 = vpop.f32.mrb[4].mxu1 }
 0x18d   : > { %2213 = vst [vmem:[%s3137_s22] sm:$0xff] %v2212_v34   ;;  %2384 = vst [vmem:[%s3137_s22 + $0x80] sm:$0xff] %v2292_v35   ;;  %v1402_v38 = vadd.f32 %v3130_v17, %v951_v36  ;;  %v1434_v39 = vadd.f32 %v3130_v17, %v1079_v37  ;;  %v953_v40 = vpop.f32.mrb[5].mxu0  ;;  %v1081_v41 = vpop.f32.mrb[5].mxu1 }
 0x18e   : > { %v954_v42 = vpop.f32.mrb[6].mxu0  ;;  %v1082_v43 = vpop.f32.mrb[6].mxu1 }
 0x18f   : > { %v1403_v44 = vadd.f32 %v3130_v17, %v954_v42  ;;  %v1435_v45 = vadd.f32 %v3130_v17, %v1082_v43  ;;  %v956_v46 = vpop.f32.mrb[7].mxu0  ;;  %v1084_v47 = vpop.f32.mrb[7].mxu1  ;;  %v1466_v48 = vmax.f32 %v1402_v38, 0.0  ;;  %v1498_v49 = vmax.f32 %v1434_v39, 0.0 }
 0x191   : > { %v1467_v50 = vmax.f32 %v1403_v44, 0.0  ;;  %v1499_v51 = vmax.f32 %v1435_v45, 0.0 }
 0x193   : > { %v2217_v52 = vpack.c.bf16 %v1467_v50, %v1466_v48  ;;  %v2297_v53 = vpack.c.bf16 %v1499_v51, %v1498_v49 }
 0x194   : > { %v959_v54 = vpop.f32.mrb[8].mxu0  ;;  %v1087_v55 = vpop.f32.mrb[8].mxu1 }
 0x195   : > { %2369 = vst [vmem:[%s3137_s22 + $0x8] sm:$0xff] %v2217_v52   ;;  %2385 = vst [vmem:[%s3137_s22 + $0x88] sm:$0xff] %v2297_v53   ;;  %v1404_v56 = vadd.f32 %v3130_v17, %v959_v54  ;;  %v1436_v57 = vadd.f32 %v3130_v17, %v1087_v55  ;;  %v961_v58 = vpop.f32.mrb[9].mxu0  ;;  %v1089_v59 = vpop.f32.mrb[9].mxu1 }
 0x196   : > { %v962_v60 = vpop.f32.mrb[10].mxu0  ;;  %v1090_v61 = vpop.f32.mrb[10].mxu1 }
 0x197   : > { %v1405_v62 = vadd.f32 %v3130_v17, %v962_v60  ;;  %v1437_v63 = vadd.f32 %v3130_v17, %v1090_v61  ;;  %v964_v0 = vpop.f32.mrb[11].mxu0  ;;  %v1092_v1 = vpop.f32.mrb[11].mxu1  ;;  %v1468_v2 = vmax.f32 %v1404_v56, 0.0  ;;  %v1500_v3 = vmax.f32 %v1436_v57, 0.0 }
 0x199   : > { %v1469_v4 = vmax.f32 %v1405_v62, 0.0  ;;  %v1501_v5 = vmax.f32 %v1437_v63, 0.0 }
 0x19b   : > { %v2222_v6 = vpack.c.bf16 %v1469_v4, %v1468_v2  ;;  %v2302_v7 = vpack.c.bf16 %v1501_v5, %v1500_v3 }
 0x19c   : > { %v967_v8 = vpop.f32.mrb[12].mxu0  ;;  %v1095_v9 = vpop.f32.mrb[12].mxu1 }
 0x19d   : > { %2370 = vst [vmem:[%s3137_s22 + $0x10] sm:$0xff] %v2222_v6   ;;  %2386 = vst [vmem:[%s3137_s22 + $0x90] sm:$0xff] %v2302_v7   ;;  %v1406_v10 = vadd.f32 %v3130_v17, %v967_v8  ;;  %v1438_v11 = vadd.f32 %v3130_v17, %v1095_v9  ;;  %v969_v12 = vpop.f32.mrb[13].mxu0  ;;  %v1097_v13 = vpop.f32.mrb[13].mxu1 }
 0x19e   : > { %v970_v14 = vpop.f32.mrb[14].mxu0  ;;  %v1098_v15 = vpop.f32.mrb[14].mxu1 }
 0x19f   : > { %v1407_v16 = vadd.f32 %v3130_v17, %v970_v14  ;;  %v1439_v18 = vadd.f32 %v3130_v17, %v1098_v15  ;;  %v972_v19 = vpop.f32.mrb[15].mxu0  ;;  %v1100_v20 = vpop.f32.mrb[15].mxu1  ;;  %v1470_v21 = vmax.f32 %v1406_v10, 0.0  ;;  %v1502_v22 = vmax.f32 %v1438_v11, 0.0 }
 0x1a1   : > { %v1471_v23 = vmax.f32 %v1407_v16, 0.0  ;;  %v1503_v24 = vmax.f32 %v1439_v18, 0.0 }
 0x1a3   : > { %v2227_v25 = vpack.c.bf16 %v1471_v23, %v1470_v21  ;;  %v2307_v26 = vpack.c.bf16 %v1503_v24, %v1502_v22 }
 0x1a4   : > { %v975_v27 = vpop.f32.mrb[16].mxu0  ;;  %v1103_v28 = vpop.f32.mrb[16].mxu1 }
 0x1a5   : > { %2371 = vst [vmem:[%s3137_s22 + $0x18] sm:$0xff] %v2227_v25   ;;  %2387 = vst [vmem:[%s3137_s22 + $0x98] sm:$0xff] %v2307_v26   ;;  %v1408_v29 = vadd.f32 %v3130_v17, %v975_v27  ;;  %v1440_v30 = vadd.f32 %v3130_v17, %v1103_v28  ;;  %v977_v31 = vpop.f32.mrb[17].mxu0  ;;  %v1105_v32 = vpop.f32.mrb[17].mxu1 }
 0x1a6   : > { %v978_v33 = vpop.f32.mrb[18].mxu0  ;;  %v1106_v34 = vpop.f32.mrb[18].mxu1 }
 0x1a7   : > { %v1409_v35 = vadd.f32 %v3130_v17, %v978_v33  ;;  %v1441_v36 = vadd.f32 %v3130_v17, %v1106_v34  ;;  %v980_v37 = vpop.f32.mrb[19].mxu0  ;;  %v1108_v38 = vpop.f32.mrb[19].mxu1  ;;  %v1472_v39 = vmax.f32 %v1408_v29, 0.0  ;;  %v1504_v40 = vmax.f32 %v1440_v30, 0.0 }
 0x1a9   : > { %v1473_v41 = vmax.f32 %v1409_v35, 0.0  ;;  %v1505_v42 = vmax.f32 %v1441_v36, 0.0 }
 0x1ab   : > { %v2232_v43 = vpack.c.bf16 %v1473_v41, %v1472_v39  ;;  %v2312_v44 = vpack.c.bf16 %v1505_v42, %v1504_v40 }
 0x1ac   : > { %v983_v45 = vpop.f32.mrb[20].mxu0  ;;  %v1111_v46 = vpop.f32.mrb[20].mxu1 }
 0x1ad   : > { %2372 = vst [vmem:[%s3137_s22 + $0x20] sm:$0xff] %v2232_v43   ;;  %2388 = vst [vmem:[%s3137_s22 + $0xa0] sm:$0xff] %v2312_v44   ;;  %v1410_v47 = vadd.f32 %v3130_v17, %v983_v45  ;;  %v1442_v48 = vadd.f32 %v3130_v17, %v1111_v46  ;;  %v985_v49 = vpop.f32.mrb[21].mxu0  ;;  %v1113_v50 = vpop.f32.mrb[21].mxu1 }
 0x1ae   : > { %v986_v51 = vpop.f32.mrb[22].mxu0  ;;  %v1114_v52 = vpop.f32.mrb[22].mxu1 }
 0x1af   : > { %v1411_v53 = vadd.f32 %v3130_v17, %v986_v51  ;;  %v1443_v54 = vadd.f32 %v3130_v17, %v1114_v52  ;;  %v988_v55 = vpop.f32.mrb[23].mxu0  ;;  %v1116_v56 = vpop.f32.mrb[23].mxu1  ;;  %v1474_v57 = vmax.f32 %v1410_v47, 0.0  ;;  %v1506_v58 = vmax.f32 %v1442_v48, 0.0 }
 0x1b1   : > { %v1475_v59 = vmax.f32 %v1411_v53, 0.0  ;;  %v1507_v60 = vmax.f32 %v1443_v54, 0.0 }
 0x1b3   : > { %v2237_v61 = vpack.c.bf16 %v1475_v59, %v1474_v57  ;;  %v2317_v62 = vpack.c.bf16 %v1507_v60, %v1506_v58 }
 0x1b4   : > { %v991_v63 = vpop.f32.mrb[24].mxu0  ;;  %v1119_v0 = vpop.f32.mrb[24].mxu1 }
 0x1b5   : > { %2373 = vst [vmem:[%s3137_s22 + $0x28] sm:$0xff] %v2237_v61   ;;  %2389 = vst [vmem:[%s3137_s22 + $0xa8] sm:$0xff] %v2317_v62   ;;  %v1412_v1 = vadd.f32 %v3130_v17, %v991_v63  ;;  %v1444_v2 = vadd.f32 %v3130_v17, %v1119_v0  ;;  %v993_v3 = vpop.f32.mrb[25].mxu0  ;;  %v1121_v4 = vpop.f32.mrb[25].mxu1 }
 0x1b6   : > { %v994_v5 = vpop.f32.mrb[26].mxu0  ;;  %v1122_v6 = vpop.f32.mrb[26].mxu1 }
 0x1b7   : > { %v1413_v7 = vadd.f32 %v3130_v17, %v994_v5  ;;  %v1445_v8 = vadd.f32 %v3130_v17, %v1122_v6  ;;  %v996_v9 = vpop.f32.mrb[27].mxu0  ;;  %v1124_v10 = vpop.f32.mrb[27].mxu1  ;;  %v1476_v11 = vmax.f32 %v1412_v1, 0.0  ;;  %v1508_v12 = vmax.f32 %v1444_v2, 0.0 }
 0x1b9   : > { %v1477_v13 = vmax.f32 %v1413_v7, 0.0  ;;  %v1509_v14 = vmax.f32 %v1445_v8, 0.0 }
 0x1bb   : > { %v2242_v15 = vpack.c.bf16 %v1477_v13, %v1476_v11  ;;  %v2322_v16 = vpack.c.bf16 %v1509_v14, %v1508_v12 }
 0x1bc   : > { %v999_v18 = vpop.f32.mrb[28].mxu0  ;;  %v1127_v19 = vpop.f32.mrb[28].mxu1 }
 0x1bd   : > { %2374 = vst [vmem:[%s3137_s22 + $0x30] sm:$0xff] %v2242_v15   ;;  %2390 = vst [vmem:[%s3137_s22 + $0xb0] sm:$0xff] %v2322_v16   ;;  %v1414_v20 = vadd.f32 %v3130_v17, %v999_v18  ;;  %v1446_v21 = vadd.f32 %v3130_v17, %v1127_v19  ;;  %v1001_v22 = vpop.f32.mrb[29].mxu0  ;;  %v1129_v23 = vpop.f32.mrb[29].mxu1 }
 0x1be   : > { %v1002_v24 = vpop.f32.mrb[30].mxu0  ;;  %v1130_v25 = vpop.f32.mrb[30].mxu1 }
 0x1bf   : > { %v1415_v26 = vadd.f32 %v3130_v17, %v1002_v24  ;;  %v1447_v27 = vadd.f32 %v3130_v17, %v1130_v25  ;;  %v1004_v28 = vpop.f32.mrb[31].mxu0  ;;  %v1132_v29 = vpop.f32.mrb[31].mxu1  ;;  %v1478_v30 = vmax.f32 %v1414_v20, 0.0  ;;  %v1510_v31 = vmax.f32 %v1446_v21, 0.0 }
 0x1c1   : > { %v1479_v32 = vmax.f32 %v1415_v26, 0.0  ;;  %v1511_v33 = vmax.f32 %v1447_v27, 0.0 }
 0x1c3   : > { %v2247_v34 = vpack.c.bf16 %v1479_v32, %v1478_v30  ;;  %v2327_v35 = vpack.c.bf16 %v1511_v33, %v1510_v31 }
 0x1c4   : > { %v1007_v36 = vpop.f32.mrb[32].mxu0  ;;  %v1135_v37 = vpop.f32.mrb[32].mxu1 }
 0x1c5   : > { %2375 = vst [vmem:[%s3137_s22 + $0x38] sm:$0xff] %v2247_v34   ;;  %2391 = vst [vmem:[%s3137_s22 + $0xb8] sm:$0xff] %v2327_v35   ;;  %v1416_v38 = vadd.f32 %v3130_v17, %v1007_v36  ;;  %v1448_v39 = vadd.f32 %v3130_v17, %v1135_v37  ;;  %v1009_v40 = vpop.f32.mrb[33].mxu0  ;;  %v1137_v41 = vpop.f32.mrb[33].mxu1 }
 0x1c6   : > { %v1010_v42 = vpop.f32.mrb[34].mxu0  ;;  %v1138_v43 = vpop.f32.mrb[34].mxu1 }
 0x1c7   : > { %v1417_v44 = vadd.f32 %v3130_v17, %v1010_v42  ;;  %v1449_v45 = vadd.f32 %v3130_v17, %v1138_v43  ;;  %v1012_v46 = vpop.f32.mrb[35].mxu0  ;;  %v1140_v47 = vpop.f32.mrb[35].mxu1  ;;  %v1480_v48 = vmax.f32 %v1416_v38, 0.0  ;;  %v1512_v49 = vmax.f32 %v1448_v39, 0.0 }
 0x1c9   : > { %v1481_v50 = vmax.f32 %v1417_v44, 0.0  ;;  %v1513_v51 = vmax.f32 %v1449_v45, 0.0 }
 0x1cb   : > { %v2252_v52 = vpack.c.bf16 %v1481_v50, %v1480_v48  ;;  %v2332_v53 = vpack.c.bf16 %v1513_v51, %v1512_v49 }
 0x1cc   : > { %v1015_v54 = vpop.f32.mrb[36].mxu0  ;;  %v1143_v55 = vpop.f32.mrb[36].mxu1 }
 0x1cd   : > { %2376 = vst [vmem:[%s3137_s22 + $0x40] sm:$0xff] %v2252_v52   ;;  %2392 = vst [vmem:[%s3137_s22 + $0xc0] sm:$0xff] %v2332_v53   ;;  %v1418_v56 = vadd.f32 %v3130_v17, %v1015_v54  ;;  %v1450_v57 = vadd.f32 %v3130_v17, %v1143_v55  ;;  %v1017_v58 = vpop.f32.mrb[37].mxu0  ;;  %v1145_v59 = vpop.f32.mrb[37].mxu1 }
 0x1ce   : > { %v1018_v60 = vpop.f32.mrb[38].mxu0  ;;  %v1146_v61 = vpop.f32.mrb[38].mxu1 }
 0x1cf   : > { %v1419_v62 = vadd.f32 %v3130_v17, %v1018_v60  ;;  %v1451_v63 = vadd.f32 %v3130_v17, %v1146_v61  ;;  %v1020_v0 = vpop.f32.mrb[39].mxu0  ;;  %v1148_v1 = vpop.f32.mrb[39].mxu1  ;;  %v1482_v2 = vmax.f32 %v1418_v56, 0.0  ;;  %v1514_v3 = vmax.f32 %v1450_v57, 0.0 }
 0x1d1   : > { %v1483_v4 = vmax.f32 %v1419_v62, 0.0  ;;  %v1515_v5 = vmax.f32 %v1451_v63, 0.0 }
 0x1d3   : > { %v2257_v6 = vpack.c.bf16 %v1483_v4, %v1482_v2  ;;  %v2337_v7 = vpack.c.bf16 %v1515_v5, %v1514_v3 }
 0x1d4   : > { %v1023_v8 = vpop.f32.mrb[40].mxu0  ;;  %v1151_v9 = vpop.f32.mrb[40].mxu1 }
 0x1d5   : > { %2377 = vst [vmem:[%s3137_s22 + $0x48] sm:$0xff] %v2257_v6   ;;  %2393 = vst [vmem:[%s3137_s22 + $0xc8] sm:$0xff] %v2337_v7   ;;  %v1420_v10 = vadd.f32 %v3130_v17, %v1023_v8  ;;  %v1452_v11 = vadd.f32 %v3130_v17, %v1151_v9  ;;  %v1025_v12 = vpop.f32.mrb[41].mxu0  ;;  %v1153_v13 = vpop.f32.mrb[41].mxu1 }
 0x1d6   : > { %v1026_v14 = vpop.f32.mrb[42].mxu0  ;;  %v1154_v15 = vpop.f32.mrb[42].mxu1 }
 0x1d7   : > { %v1421_v16 = vadd.f32 %v3130_v17, %v1026_v14  ;;  %v1453_v18 = vadd.f32 %v3130_v17, %v1154_v15  ;;  %v1028_v19 = vpop.f32.mrb[43].mxu0  ;;  %v1156_v20 = vpop.f32.mrb[43].mxu1  ;;  %v1484_v21 = vmax.f32 %v1420_v10, 0.0  ;;  %v1516_v22 = vmax.f32 %v1452_v11, 0.0 }
 0x1d9   : > { %v1485_v23 = vmax.f32 %v1421_v16, 0.0  ;;  %v1517_v24 = vmax.f32 %v1453_v18, 0.0 }
 0x1db   : > { %v2262_v25 = vpack.c.bf16 %v1485_v23, %v1484_v21  ;;  %v2342_v26 = vpack.c.bf16 %v1517_v24, %v1516_v22 }
 0x1dc   : > { %v1031_v27 = vpop.f32.mrb[44].mxu0  ;;  %v1159_v28 = vpop.f32.mrb[44].mxu1 }
 0x1dd   : > { %2378 = vst [vmem:[%s3137_s22 + $0x50] sm:$0xff] %v2262_v25   ;;  %2394 = vst [vmem:[%s3137_s22 + $0xd0] sm:$0xff] %v2342_v26   ;;  %v1422_v29 = vadd.f32 %v3130_v17, %v1031_v27  ;;  %v1454_v30 = vadd.f32 %v3130_v17, %v1159_v28  ;;  %v1033_v31 = vpop.f32.mrb[45].mxu0  ;;  %v1161_v32 = vpop.f32.mrb[45].mxu1 }
 0x1de   : > { %v1034_v33 = vpop.f32.mrb[46].mxu0  ;;  %v1162_v34 = vpop.f32.mrb[46].mxu1 }
 0x1df   : > { %v1423_v35 = vadd.f32 %v3130_v17, %v1034_v33  ;;  %v1455_v36 = vadd.f32 %v3130_v17, %v1162_v34  ;;  %v1036_v37 = vpop.f32.mrb[47].mxu0  ;;  %v1164_v38 = vpop.f32.mrb[47].mxu1  ;;  %v1486_v39 = vmax.f32 %v1422_v29, 0.0  ;;  %v1518_v40 = vmax.f32 %v1454_v30, 0.0 }
 0x1e1   : > { %v1487_v41 = vmax.f32 %v1423_v35, 0.0  ;;  %v1519_v42 = vmax.f32 %v1455_v36, 0.0 }
 0x1e3   : > { %v2267_v43 = vpack.c.bf16 %v1487_v41, %v1486_v39  ;;  %v2347_v44 = vpack.c.bf16 %v1519_v42, %v1518_v40 }
 0x1e4   : > { %v1039_v45 = vpop.f32.mrb[48].mxu0  ;;  %v1167_v46 = vpop.f32.mrb[48].mxu1 }
 0x1e5   : > { %2379 = vst [vmem:[%s3137_s22 + $0x58] sm:$0xff] %v2267_v43   ;;  %2395 = vst [vmem:[%s3137_s22 + $0xd8] sm:$0xff] %v2347_v44   ;;  %v1424_v47 = vadd.f32 %v3130_v17, %v1039_v45  ;;  %v1456_v48 = vadd.f32 %v3130_v17, %v1167_v46  ;;  %v1041_v49 = vpop.f32.mrb[49].mxu0  ;;  %v1169_v50 = vpop.f32.mrb[49].mxu1 }
 0x1e6   : > { %v1042_v51 = vpop.f32.mrb[50].mxu0  ;;  %v1170_v52 = vpop.f32.mrb[50].mxu1 }
 0x1e7   : > { %v1425_v53 = vadd.f32 %v3130_v17, %v1042_v51  ;;  %v1457_v54 = vadd.f32 %v3130_v17, %v1170_v52  ;;  %v1044_v55 = vpop.f32.mrb[51].mxu0  ;;  %v1172_v56 = vpop.f32.mrb[51].mxu1  ;;  %v1488_v57 = vmax.f32 %v1424_v47, 0.0  ;;  %v1520_v58 = vmax.f32 %v1456_v48, 0.0 }
 0x1e9   : > { %v1489_v59 = vmax.f32 %v1425_v53, 0.0  ;;  %v1521_v60 = vmax.f32 %v1457_v54, 0.0 }
 0x1eb   : > { %v2272_v61 = vpack.c.bf16 %v1489_v59, %v1488_v57  ;;  %v2352_v62 = vpack.c.bf16 %v1521_v60, %v1520_v58 }
 0x1ec   : > { %v1047_v63 = vpop.f32.mrb[52].mxu0  ;;  %v1175_v0 = vpop.f32.mrb[52].mxu1 }
 0x1ed   : > { %2380 = vst [vmem:[%s3137_s22 + $0x60] sm:$0xff] %v2272_v61   ;;  %2396 = vst [vmem:[%s3137_s22 + $0xe0] sm:$0xff] %v2352_v62   ;;  %v1426_v1 = vadd.f32 %v3130_v17, %v1047_v63  ;;  %v1458_v2 = vadd.f32 %v3130_v17, %v1175_v0  ;;  %v1049_v3 = vpop.f32.mrb[53].mxu0  ;;  %v1177_v4 = vpop.f32.mrb[53].mxu1 }
 0x1ee   : > { %v1050_v5 = vpop.f32.mrb[54].mxu0  ;;  %v1178_v6 = vpop.f32.mrb[54].mxu1 }
 0x1ef   : > { %v1427_v7 = vadd.f32 %v3130_v17, %v1050_v5  ;;  %v1459_v8 = vadd.f32 %v3130_v17, %v1178_v6  ;;  %v1052_v9 = vpop.f32.mrb[55].mxu0  ;;  %v1180_v10 = vpop.f32.mrb[55].mxu1  ;;  %v1490_v11 = vmax.f32 %v1426_v1, 0.0  ;;  %v1522_v12 = vmax.f32 %v1458_v2, 0.0 }
 0x1f1   : > { %v1491_v13 = vmax.f32 %v1427_v7, 0.0  ;;  %v1523_v14 = vmax.f32 %v1459_v8, 0.0 }
 0x1f3   : > { %v2277_v15 = vpack.c.bf16 %v1491_v13, %v1490_v11  ;;  %v2357_v16 = vpack.c.bf16 %v1523_v14, %v1522_v12 }
 0x1f4   : > { %v1055_v18 = vpop.f32.mrb[56].mxu0  ;;  %v1183_v19 = vpop.f32.mrb[56].mxu1 }
 0x1f5   : > { %2381 = vst [vmem:[%s3137_s22 + $0x68] sm:$0xff] %v2277_v15   ;;  %2397 = vst [vmem:[%s3137_s22 + $0xe8] sm:$0xff] %v2357_v16   ;;  %v1428_v20 = vadd.f32 %v3130_v17, %v1055_v18  ;;  %v1460_v21 = vadd.f32 %v3130_v17, %v1183_v19  ;;  %v1057_v22 = vpop.f32.mrb[57].mxu0  ;;  %v1185_v23 = vpop.f32.mrb[57].mxu1 }
 0x1f6   : > { %v1058_v24 = vpop.f32.mrb[58].mxu0  ;;  %v1186_v25 = vpop.f32.mrb[58].mxu1 }
 0x1f7   : > { %v1429_v26 = vadd.f32 %v3130_v17, %v1058_v24  ;;  %v1461_v27 = vadd.f32 %v3130_v17, %v1186_v25  ;;  %v1060_v28 = vpop.f32.mrb[59].mxu0  ;;  %v1188_v29 = vpop.f32.mrb[59].mxu1  ;;  %v1492_v30 = vmax.f32 %v1428_v20, 0.0  ;;  %v1524_v31 = vmax.f32 %v1460_v21, 0.0 }
 0x1f9   : > { %v1493_v32 = vmax.f32 %v1429_v26, 0.0  ;;  %v1525_v33 = vmax.f32 %v1461_v27, 0.0 }
 0x1fb   : > { %v2282_v34 = vpack.c.bf16 %v1493_v32, %v1492_v30  ;;  %v2362_v35 = vpack.c.bf16 %v1525_v33, %v1524_v31 }
 0x1fc   : > { %v1063_v36 = vpop.f32.mrb[60].mxu0  ;;  %v1191_v37 = vpop.f32.mrb[60].mxu1 }
 0x1fd   : > { %2382 = vst [vmem:[%s3137_s22 + $0x70] sm:$0xff] %v2282_v34   ;;  %2398 = vst [vmem:[%s3137_s22 + $0xf0] sm:$0xff] %v2362_v35   ;;  %v1430_v38 = vadd.f32 %v3130_v17, %v1063_v36  ;;  %v1462_v39 = vadd.f32 %v3130_v17, %v1191_v37  ;;  %v1065_v40 = vpop.f32.mrb[61].mxu0  ;;  %v1193_v41 = vpop.f32.mrb[61].mxu1 }
 0x1fe   : > { %v1066_v42 = vpop.f32.mrb[62].mxu0  ;;  %v1194_v43 = vpop.f32.mrb[62].mxu1 }
 0x1ff   : > { %v1431_v44 = vadd.f32 %v3130_v17, %v1066_v42  ;;  %v1463_v45 = vadd.f32 %v3130_v17, %v1194_v43  ;;  %v1068_v46 = vpop.f32.mrb[63].mxu0  ;;  %v1196_v47 = vpop.f32.mrb[63].mxu1  ;;  %v1494_v48 = vmax.f32 %v1430_v38, 0.0  ;;  %v1526_v49 = vmax.f32 %v1462_v39, 0.0 }
 0x201   : > { %v1495_v50 = vmax.f32 %v1431_v44, 0.0  ;;  %v1527_v51 = vmax.f32 %v1463_v45, 0.0 }
 0x203   : > { %v2287_v17 = vpack.c.bf16 %v1495_v50, %v1494_v48  ;;  %v2367_v52 = vpack.c.bf16 %v1527_v51, %v1526_v49 }
 0x205   : > { %2383 = vst [vmem:[%s3137_s22 + $0x78] sm:$0xff] %v2287_v17   ;;  %2399 = vst [vmem:[%s3137_s22 + $0xf8] sm:$0xff] %v2367_v52  }
 0x206   : > { %2733 = shalt.err (!%p2730_p5)
}
 0x207   : > { %s2734_s10 = scalar_lea.hbm %s3234_s9, 4096  ;;  %s2738_s29 = scalar_lea.hbm %s3289_s3, 200704 }
 0x208   : > { %p2735_p9 = scmp.ne.s32.totalorder %s3234_s9, %s2734_s10  ;;  %p2739_p3 = scmp.lt.u32.totalorder %s3234_s9, %s3289_s3 }
 0x209   : > { %p2740_p7 = scmp.lt.u32.totalorder %s2738_s29, %s2734_s10  ;;  %p2742_p1 = scmp.lt.u32.totalorder %s2734_s10, %s3234_s9 }
 0x20a   : > { %p2736_p12 = pnand %p2735_p9, %p2965_p8 }
 0x20b   : > { %p2741_p10 = por %p2740_p7, %p2739_p3 }
 0x20c   : > { %p2737_p11 = pneg %p2736_p12 }
 0x20d   : > { %p2743_p2 = por %p2742_p1, %p2741_p10 }
 0x20f   : > { %p2744_p4 = pnand %p2743_p2, %p2737_p11 }
 0x211   : > { %2747 = shalt.err (!%p2744_p4)
}
 0x212   : > { %s2817_s22 = smov 64   ;;  %s2818_s24 = smov 4  }
 0x213   : > { %2442 = dma.vmem_to_hbm [thread:$0]  (%p2965_p8), %s3236_s7, 4096, %s3234_s9, %s1849_s15, %s2817_s22, %s2817_s22, %s2818_s24  }
 0x214 PF: > { %p2464_p6 = scmp.ge.s32.totalorder %s2806_s17, 2  ;;  %s1878_s8 = sand.u32 1, %s2786_s12  }
 0x215   : > { %p3306_p13 = scmp.ne.s32.totalorder %s3297_s23, 0  ;;  %s1879_s26 = scalar_lea.sflag [#allocation5], %s1878_s8 }
 0x217   : > { %p2456_p0 = pnand %p2464_p6, %p3306_p13 }
 0x219   : > { %2781 = dma.done.wait (!%p2456_p0), %s1879_s26, 4096  }
 0x21a   : > { %2783 = vsyncadd (!%p2456_p0), %s1879_s26, 4294963200  ;;  %s20_s17 = sadd.s32 1, %s2806_s17   ;;  %s3307_s12 = smov %s2790_s13 }
 0x21b   : > { %p17_p5 = scmp.ge.s32.totalorder %s20_s17, 51   ;;  %s3308_s13 = smov %s2794_s14 }
 0x21c   : > { %s3309_s14 = smov %s2974_s4  ;;  %s3310_s15 = smov %s2802_s16 }
 0x21d   : > { %s3311_s16 = smov %s3313_s18  ;;  %19 = sbr.rel (!%p17_p5) target bundleno = 7 (0x7), region = 95 }
 0x224   :  { %1884 = vsyncpa [#allocation4], 1 }
 0x225   :  { %1886 = vsyncpa [#allocation4 + $0x1], 1 }
 0x226   :  { %1887 = vsyncpa [#allocation7], 1 }
 0x227   :  { %1888 = vsyncpa [#allocation5], 1 }
 0x228   :  { %1890 = vsyncpa [#allocation5 + $0x1], 1 }

</bundles_post_ra>
